<compile_context>
chip_gen: v6e
topology: v6e:2x2x1
jax: 0.10.0
libtpu: 0.0.40
codegen_flags: <defaults>
</compile_context>

<pallas_src>
import functools

import jax
import jax.numpy as jnp
from jax.experimental import pallas as pl
from jax.experimental.pallas import tpu as pltpu

NDF = 4            # cfg.GAN.DF_DIM
EFG = 8            # ef_dim (cfg.TRAIN.CAT_Z != 'concat' -> EMBEDDING_DIM)
ENTITY = 10        # cfg.GAN.ENTITY_DIM -> fc_ac outputs ENTITY + 1 classes
BN_EPS = 1e-5
LRELU_SLOPE = 0.2
LANES = 128


def _round_up(x, m):
    return (x + m - 1) // m * m


def _choose_tm(m):
    """M-tile size: big tiles, but keep >=2 blocks on the parallel axis (v7x)."""
    if m >= 2048:
        return 1024
    if m >= 32:
        return _round_up(m // 2, 16)
    return 16


# ----------------------------- Pallas kernels ------------------------------

def _matmul_stats_kernel(a_ref, b_ref, y_ref, sum_ref, sq_ref):
    """One M tile: y = A @ B (bf16 operands, f32 accumulate) + per-tile column
    sum / sum-of-squares for BatchNorm, written into row 0 of an 8-row block."""
    y = jnp.dot(a_ref[...], b_ref[...], preferred_element_type=jnp.float32)
    y_ref[...] = y
    s = jnp.sum(y, axis=0, keepdims=True)
    q = jnp.sum(y * y, axis=0, keepdims=True)
    rows = jax.lax.broadcasted_iota(jnp.int32, sum_ref.shape, 0)
    sum_ref[...] = jnp.where(rows == 0, s, 0.0)
    sq_ref[...] = jnp.where(rows == 0, q, 0.0)


def pallas_matmul_stats(a, b, tm):
    """a: [Mp, K] bf16, b: [K, Nq] bf16 (Nq multiple of 128, Mp multiple of tm).
    Returns y [Mp, Nq] f32 plus per-M-tile partial column sums / sums-of-squares
    (zero-filled to 8 rows per tile so output blocks stay (8,128)-aligned)."""
    mp, k = a.shape
    _, nq = b.shape
    mg = mp // tm
    return pl.pallas_call(
        _matmul_stats_kernel,
        out_shape=(jax.ShapeDtypeStruct((mp, nq), jnp.float32),
                   jax.ShapeDtypeStruct((mg * 8, nq), jnp.float32),
                   jax.ShapeDtypeStruct((mg * 8, nq), jnp.float32)),
        grid_spec=pltpu.PrefetchScalarGridSpec(
            num_scalar_prefetch=0,
            grid=(mg,),
            in_specs=[pl.BlockSpec((tm, k), lambda m: (m, 0)),
                      pl.BlockSpec((k, nq), lambda m: (0, 0))],
            out_specs=(pl.BlockSpec((tm, nq), lambda m: (m, 0)),
                       pl.BlockSpec((8, nq), lambda m: (m, 0)),
                       pl.BlockSpec((8, nq), lambda m: (m, 0)))),
        compiler_params=pltpu.CompilerParams(
            dimension_semantics=("parallel",)),
    )(a, b)


def _affine_lrelu_kernel(y_ref, s_ref, b_ref, o_ref):
    cout = o_ref.shape[-1]
    y = y_ref[...] * s_ref[...] + b_ref[...]          # f32 math on lane-dense slab
    y = jnp.where(y > 0, y, LRELU_SLOPE * y)
    o_ref[...] = y[:, :cout].astype(o_ref.dtype)      # store only useful columns


def pallas_affine_lrelu(y, scale, shift, cout, tm, out_dtype=jnp.bfloat16):
    """LeakyReLU(0.2)(y * scale + shift); writes only the first `cout` columns."""
    mp, nq = y.shape
    return pl.pallas_call(
        _affine_lrelu_kernel,
        out_shape=jax.ShapeDtypeStruct((mp, cout), out_dtype),
        grid_spec=pltpu.PrefetchScalarGridSpec(
            num_scalar_prefetch=0,
            grid=(mp // tm,),
            in_specs=[pl.BlockSpec((tm, nq), lambda m: (m, 0)),
                      pl.BlockSpec((1, nq), lambda m: (0, 0)),
                      pl.BlockSpec((1, nq), lambda m: (0, 0))],
            out_specs=pl.BlockSpec((tm, cout), lambda m: (m, 0))),
        compiler_params=pltpu.CompilerParams(
            dimension_semantics=("parallel",)),
    )(y, scale, shift)


def _head_kernel(x_ref, w_ref, b_ref, o_ref):
    y = jnp.dot(x_ref[...], w_ref[...],
                preferred_element_type=jnp.float32) + b_ref[...]
    o_ref[...] = 1.0 / (1.0 + jnp.exp(-y))


def pallas_sigmoid_head(x, w, b):
    """Tiny matmul + bias + sigmoid, whole arrays as a single block."""
    m, k = x.shape
    _, n = w.shape
    return pl.pallas_call(
        _head_kernel,
        out_shape=jax.ShapeDtypeStruct((m, n), jnp.float32),
        grid=(1,),
        in_specs=[pl.BlockSpec((m, k), lambda i: (0, 0)),
                  pl.BlockSpec((k, n), lambda i: (0, 0)),
                  pl.BlockSpec((1, n), lambda i: (0, 0))],
        out_specs=pl.BlockSpec((m, n), lambda i: (0, 0)),
    )(x, w, b)


def _fc_logsoftmax_kernel(n_valid, x_ref, w_ref, b_ref, o_ref):
    logits = jnp.dot(x_ref[...], w_ref[...],
                     preferred_element_type=jnp.float32) + b_ref[...]
    col = jax.lax.broadcasted_iota(jnp.int32, logits.shape, 1)
    valid = col < n_valid
    masked = jnp.where(valid, logits, -1e30)
    mx = jnp.max(masked, axis=1, keepdims=True)
    ex = jnp.where(valid, jnp.exp(logits - mx), 0.0)
    lse = jnp.log(jnp.sum(ex, axis=1, keepdims=True)) + mx
    o_ref[...] = logits - lse


def pallas_fc_logsoftmax(x, w, b, n_valid):
    m, k = x.shape
    _, n = w.shape
    return pl.pallas_call(
        functools.partial(_fc_logsoftmax_kernel, n_valid),
        out_shape=jax.ShapeDtypeStruct((m, n), jnp.float32),
        grid=(1,),
        in_specs=[pl.BlockSpec((m, k), lambda i: (0, 0)),
                  pl.BlockSpec((k, n), lambda i: (0, 0)),
                  pl.BlockSpec((1, n), lambda i: (0, 0))],
        out_specs=pl.BlockSpec((m, n), lambda i: (0, 0)),
    )(x, w, b)


# ------------------------------- glue (JAX) --------------------------------

def _im2col(x, k, s, p):
    """x: [N, H, W, C] -> patches [N*Ho*Wo, k*k*C] with K order (kh, kw, Cin)."""
    n, h, w, c = x.shape
    ho = (h + 2 * p - k) // s + 1
    wo = (w + 2 * p - k) // s + 1
    xp = jnp.pad(x, ((0, 0), (p, p), (p, p), (0, 0))) if p else x
    cols = []
    for dy in range(k):
        for dx in range(k):
            cols.append(xp[:, dy:dy + s * ho:s, dx:dx + s * wo:s, :])
    patches = jnp.stack(cols, axis=3)                 # [N, Ho, Wo, k*k, C]
    return patches.reshape(n * ho * wo, k * k * c), ho, wo
    # TODO(synk): fold im2col into the matmul kernel (per-tap grid axis / manual DMA)
    # to avoid materializing the patch tensor for the first layers.


def _weight_matrix(w_oihw, dtype=jnp.bfloat16):
    cout, cin, kh, kw = w_oihw.shape
    return jnp.transpose(w_oihw, (2, 3, 1, 0)).reshape(kh * kw * cin, cout).astype(dtype)


def conv_block(x, w_oihw, stride, pad, bn):
    """Conv2d(bias=False) [+ BatchNorm2d train-mode batch stats] + LeakyReLU(0.2).
    x: [N, H, W, Cin] bf16.  Returns [N, Ho, Wo, Cout] bf16."""
    n = x.shape[0]
    cout, cin, kh, kw = w_oihw.shape
    patches, ho, wo = _im2col(x, kh, stride, pad)          # bf16 [M, K]
    m, k = patches.shape
    wmat = _weight_matrix(w_oihw)                          # bf16 [K, cout]

    # bf16 sublane packing prefers K % 16 == 0 (only the joint conv needs this).
    kp = _round_up(k, 16)
    if kp != k:
        patches = jnp.pad(patches, ((0, 0), (0, kp - k)))
        wmat = jnp.pad(wmat, ((0, kp - k), (0, 0)))

    nq = _round_up(cout, LANES)                            # lane-dense intermediate
    wmat = jnp.pad(wmat, ((0, 0), (0, nq - cout)))

    tm = _choose_tm(m)
    mp = _round_up(m, tm)
    if mp != m:
        patches = jnp.pad(patches, ((0, mp - m), (0, 0)))

    y, psum, psq = pallas_matmul_stats(patches, wmat, tm)  # fused BN stats

    if bn is not None:
        gamma, beta = bn
        tot = jnp.sum(psum, axis=0)                        # padded rows are exact zeros
        tot_sq = jnp.sum(psq, axis=0)
        mean = tot / m
        var = jnp.maximum(tot_sq / m - mean * mean, 0.0)   # clamp cancellation
        inv = jax.lax.rsqrt(var + BN_EPS)
        g = jnp.pad(gamma, (0, nq - cout), constant_values=1.0)
        b = jnp.pad(beta, (0, nq - cout))
        scale = (g * inv).reshape(1, nq)
        shift = (b - mean * g * inv).reshape(1, nq)
    else:
        scale = jnp.ones((1, nq), jnp.float32)
        shift = jnp.zeros((1, nq), jnp.float32)

    out = pallas_affine_lrelu(y, scale, shift, cout, tm)   # [Mp, cout] bf16
    if mp != m:
        out = out[:m]
    return out.reshape(n, ho, wo, cout)


def sigmoid_logits_head(x, w_oihw, bias):
    """Conv2d(cin, 1, kernel_size=4, stride=4, bias=True) + Sigmoid on a 4x4 map."""
    n = x.shape[0]
    cout = w_oihw.shape[0]
    patches, ho, wo = _im2col(x, 4, 4, 0)                  # bf16 [N, 512]
    m, k = patches.shape
    wmat = _weight_matrix(w_oihw)                          # bf16 [512, 1]
    mp, np_ = _round_up(m, 8), LANES
    xq = jnp.pad(patches, ((0, mp - m), (0, 0)))
    wq = jnp.pad(wmat, ((0, 0), (0, np_ - cout)))
    bq = jnp.pad(bias.reshape(1, cout).astype(jnp.float32), ((0, 0), (0, np_ - cout)))
    out = pallas_sigmoid_head(xq, wq, bq)
    return out[:m, :cout].reshape(n, ho, wo, cout)


def fc_logsoftmax(x_code_nhwc, w, b):
    """nn.Linear(ndf*8*4*4, ENTITY+1) on NCHW-flattened x_code, then log_softmax(dim=1)."""
    n = x_code_nhwc.shape[0]
    flat = jnp.transpose(x_code_nhwc, (0, 3, 1, 2)).reshape(n, -1)   # PyTorch (C,H,W) order
    nout = w.shape[0]
    mp, np_ = _round_up(n, 8), _round_up(nout, LANES)
    xq = jnp.pad(flat, ((0, mp - n), (0, 0)))
    wq = jnp.pad(jnp.transpose(w).astype(jnp.bfloat16), ((0, 0), (0, np_ - nout)))
    bq = jnp.pad(b.reshape(1, nout).astype(jnp.float32), ((0, 0), (0, np_ - nout)))
    out = pallas_fc_logsoftmax(xq, wq, bq, nout)
    return out[:n, :nout]


# ------------------------- parameters & forward pass -----------------------

def init_params(key):
    ndf, efg = NDF, EFG
    state = {"key": key}

    def nxt():
        state["key"], sub = jax.random.split(state["key"])
        return sub

    def conv(cout, cin, k):
        return 0.05 * jax.random.normal(nxt(), (cout, cin, k, k), jnp.float32)

    def bn(c):
        return (1.0 + 0.1 * jax.random.normal(nxt(), (c,), jnp.float32),
                0.1 * jax.random.normal(nxt(), (c,), jnp.float32))

    trunk = []
    # encode_image_by_16times(ndf): first conv has no BN
    trunk.append(dict(w=conv(ndf, 3, 4), stride=2, pad=1, bn=None))
    trunk.append(dict(w=conv(ndf * 2, ndf, 4), stride=2, pad=1, bn=bn(ndf * 2)))
    trunk.append(dict(w=conv(ndf * 4, ndf * 2, 4), stride=2, pad=1, bn=bn(ndf * 4)))
    trunk.append(dict(w=conv(ndf * 8, ndf * 4, 4), stride=2, pad=1, bn=bn(ndf * 8)))
    # img_code_s32: downBlock(ndf*8, ndf*16)
    trunk.append(dict(w=conv(ndf * 16, ndf * 8, 4), stride=2, pad=1, bn=bn(ndf * 16)))
    # img_code_s32_1: Block3x3_leakRelu(ndf*16, ndf*8)
    trunk.append(dict(w=conv(ndf * 8, ndf * 16, 3), stride=1, pad=1, bn=bn(ndf * 8)))

    return dict(
        trunk=trunk,
        joint=dict(w=conv(ndf * 8, ndf * 8 + efg, 3), stride=1, pad=1, bn=bn(ndf * 8)),
        logits_w=conv(1, ndf * 8, 4),
        logits_b=0.05 * jax.random.normal(nxt(), (1,), jnp.float32),
        uncond_w=conv(1, ndf * 8, 4),
        uncond_b=0.05 * jax.random.normal(nxt(), (1,), jnp.float32),
        fc_w=0.05 * jax.random.normal(nxt(), (ENTITY + 1, ndf * 8 * 4 * 4), jnp.float32),
        fc_b=0.05 * jax.random.normal(nxt(), (ENTITY + 1,), jnp.float32),
    )


def joint_d_net128_forward(params, x_nchw, c_code):
    """x_nchw: [N, 3, 128, 128] (PyTorch NCHW), c_code: [N, EFG].
    Returns [sen_match (N,), real (N,), cp (N, ENTITY+1)] like the PyTorch module
    (use_cap=False path)."""
    x = jnp.transpose(x_nchw, (0, 2, 3, 1)).astype(jnp.bfloat16)      # -> NHWC bf16
    # Pad 3 input channels -> 8 so the first im2col K is exactly 4*4*8 = 128.
    x = jnp.pad(x, ((0, 0), (0, 0), (0, 0), (0, 8 - 3)))
    trunk = params["trunk"]
    w0 = jnp.pad(trunk[0]["w"], ((0, 0), (0, 8 - 3), (0, 0), (0, 0)))
    x = conv_block(x, w0, trunk[0]["stride"], trunk[0]["pad"], trunk[0]["bn"])
    for layer in trunk[1:]:
        x = conv_block(x, layer["w"], layer["stride"], layer["pad"], layer["bn"])
    x_code = x                                                        # [N, 4, 4, ndf*8]

    n, h, w, _ = x_code.shape
    # c_code.view(-1, ef, 1, 1).repeat(1, 1, 4, 4); torch.cat((c_code, x_code), 1)
    c = jnp.broadcast_to(c_code.reshape(n, 1, 1, EFG).astype(jnp.bfloat16),
                         (n, h, w, EFG))
    h_c = jnp.concatenate([c, x_code], axis=-1)
    jl = params["joint"]
    h_c = conv_block(h_c, jl["w"], jl["stride"], jl["pad"], jl["bn"])

    sen_match = sigmoid_logits_head(h_c, params["logits_w"], params["logits_b"]).reshape(-1)
    real = sigmoid_logits_head(x_code, params["uncond_w"], params["uncond_b"]).reshape(-1)
    cp = fc_logsoftmax(x_code, params["fc_w"], params["fc_b"])
    # TODO(synk): use_cap=True CapsuleLinear branch not implemented (module default is False).
    return [sen_match, real, cp]


if __name__ == "__main__":
    key = jax.random.PRNGKey(0)
    kx, kc, kp = jax.random.split(key, 3)
    N = 2
    # JOINT_D_NET128 requires 128x128 input (5 stride-2 convs -> 4x4, then 4x4/s4 logits).
    x = jax.random.normal(kx, (N, 3, 128, 128), jnp.float32)
    c_code = jax.random.normal(kc, (N, EFG), jnp.float32)
    params = init_params(kp)

    outs = joint_d_net128_forward(params, x, c_code)
    outs = [jax.block_until_ready(o) for o in outs]
    sen_match, real, cp = outs

    assert sen_match.shape == (N,) and real.shape == (N,)
    assert cp.shape == (N, ENTITY + 1)
    for o in outs:
        assert bool(jnp.all(jnp.isfinite(o)))
    assert bool(jnp.all((sen_match >= 0) & (sen_match <= 1)))
    assert bool(jnp.all((real >= 0) & (real <= 1)))
    assert bool(jnp.all(jnp.abs(jnp.sum(jnp.exp(cp), axis=1) - 1.0) < 1e-3))
    print("KERNEL_OK")
</pallas_src>

<mosaic_0001>
module attributes {stable_mosaic.version = 11 : i64} {
  func.func @_matmul_stats_kernel(%arg0: i32, %arg1: memref<1024x128xbf16, #tpu.memory_space<vmem>>, %arg2: memref<128x128xbf16, #tpu.memory_space<vmem>>, %arg3: memref<1024x128xf32, #tpu.memory_space<vmem>>, %arg4: memref<8x128xf32, #tpu.memory_space<vmem>>, %arg5: memref<8x128xf32, #tpu.memory_space<vmem>>) attributes {dimension_semantics = [#tpu.dimension_semantics<parallel>], iteration_bounds = array<i64: 8>, scalar_prefetch = 0 : i64, scratch_operands = 0 : i64, tpu.core_type = #tpu.core_type<tc>, window_params = [{transform_indices = @transform_0, window_bounds = array<i64: 1024, 128>}, {pipeline_mode = #tpu.pipeline_mode<synchronous>, transform_indices = @transform_1, window_bounds = array<i64: 128, 128>}, {transform_indices = @transform_2, window_bounds = array<i64: 1024, 128>}, {transform_indices = @transform_3, window_bounds = array<i64: 8, 128>}, {transform_indices = @transform_4, window_bounds = array<i64: 8, 128>}]} {
    %c0 = arith.constant 0 : index
    %c0_0 = arith.constant 0 : index
    %0 = vector.load %arg1[%c0, %c0_0] : memref<1024x128xbf16, #tpu.memory_space<vmem>>, vector<1024x128xbf16>
    %c0_1 = arith.constant 0 : index
    %c0_2 = arith.constant 0 : index
    %1 = vector.load %arg2[%c0_1, %c0_2] : memref<128x128xbf16, #tpu.memory_space<vmem>>, vector<128x128xbf16>
    %cst = arith.constant dense<0.000000e+00> : vector<1024x128xf32>
    %2 = tpu.matmul %0, %1, %cst {dimension_numbers = #tpu.dot_dimension_numbers<[1], [0], [0], [1], [0, 0, 1, 1], [], []>} : vector<1024x128xbf16>, vector<128x128xbf16>, vector<1024x128xf32> -> vector<1024x128xf32>
    %c0_3 = arith.constant 0 : index
    %c0_4 = arith.constant 0 : index
    %3 = vector.load %arg3[%c0_3, %c0_4] : memref<1024x128xf32, #tpu.memory_space<vmem>>, vector<1024x128xf32>
    tpu.vector_store %arg3[%c0_3, %c0_4], %2 {strides = array<i32>} : memref<1024x128xf32, #tpu.memory_space<vmem>>, vector<1024x128xf32>,
    %cst_5 = arith.constant dense<0.000000e+00> : vector<128xf32>
    %4 = vector.multi_reduction <add>, %2, %cst_5 [0] : vector<1024x128xf32> to vector<128xf32>
    %5 = vector.shape_cast %4 : vector<128xf32> to vector<1x128xf32>
    %6 = arith.mulf %2, %2 : vector<1024x128xf32>
    %cst_6 = arith.constant dense<0.000000e+00> : vector<128xf32>
    %7 = vector.multi_reduction <add>, %6, %cst_6 [0] : vector<1024x128xf32> to vector<128xf32>
    %8 = vector.shape_cast %7 : vector<128xf32> to vector<1x128xf32>
    %9 = tpu.iota {dimensions = array<i32: 0>} : vector<8x128xi32>
    %c0_i32 = arith.constant 0 : i32
    %10 = vector.broadcast %c0_i32 : i32 to vector<8x128xi32>
    %11 = arith.cmpi eq, %9, %10 : vector<8x128xi32>
    %cst_7 = arith.constant 0.000000e+00 : f32
    %12 = vector.shape_cast %5 : vector<1x128xf32> to vector<1x128xf32>
    %13 = vector.broadcast %12 : vector<1x128xf32> to vector<8x128xf32>
    %14 = vector.broadcast %cst_7 : f32 to vector<8x128xf32>
    %15 = arith.select %11, %13, %14 : vector<8x128xi1>, vector<8x128xf32>
    %c0_8 = arith.constant 0 : index
    %c0_9 = arith.constant 0 : index
    %16 = vector.load %arg4[%c0_8, %c0_9] : memref<8x128xf32, #tpu.memory_space<vmem>>, vector<8x128xf32>
    tpu.vector_store %arg4[%c0_8, %c0_9], %15 {strides = array<i32>} : memref<8x128xf32, #tpu.memory_space<vmem>>, vector<8x128xf32>,
    %c0_i32_10 = arith.constant 0 : i32
    %17 = vector.broadcast %c0_i32_10 : i32 to vector<8x128xi32>
    %18 = arith.cmpi eq, %9, %17 : vector<8x128xi32>
    %cst_11 = arith.constant 0.000000e+00 : f32
    %19 = vector.shape_cast %8 : vector<1x128xf32> to vector<1x128xf32>
    %20 = vector.broadcast %19 : vector<1x128xf32> to vector<8x128xf32>
    %21 = vector.broadcast %cst_11 : f32 to vector<8x128xf32>
    %22 = arith.select %18, %20, %21 : vector<8x128xi1>, vector<8x128xf32>
    %c0_12 = arith.constant 0 : index
    %c0_13 = arith.constant 0 : index
    %23 = vector.load %arg5[%c0_12, %c0_13] : memref<8x128xf32, #tpu.memory_space<vmem>>, vector<8x128xf32>
    tpu.vector_store %arg5[%c0_12, %c0_13], %22 {strides = array<i32>} : memref<8x128xf32, #tpu.memory_space<vmem>>, vector<8x128xf32>,
    return
  }
  func.func @transform_0(%arg0: i32) -> (i32, i32) {
    %c0_i32 = arith.constant 0 : i32
    %c0_i32_0 = arith.constant 0 : i32
    return %arg0, %c0_i32 : i32, i32
  }
  func.func @transform_1(%arg0: i32) -> (i32, i32) {
    %c0_i32 = arith.constant 0 : i32
    %c0_i32_0 = arith.constant 0 : i32
    %c0_i32_1 = arith.constant 0 : i32
    return %c0_i32, %c0_i32_0 : i32, i32
  }
  func.func @transform_2(%arg0: i32) -> (i32, i32) {
    %c0_i32 = arith.constant 0 : i32
    %c0_i32_0 = arith.constant 0 : i32
    return %arg0, %c0_i32 : i32, i32
  }
  func.func @transform_3(%arg0: i32) -> (i32, i32) {
    %c0_i32 = arith.constant 0 : i32
    %c0_i32_0 = arith.constant 0 : i32
    return %arg0, %c0_i32 : i32, i32
  }
  func.func @transform_4(%arg0: i32) -> (i32, i32) {
    %c0_i32 = arith.constant 0 : i32
    %c0_i32_0 = arith.constant 0 : i32
    return %arg0, %c0_i32 : i32, i32
  }
}

</mosaic_0001>

<bundles_post_ra>
// kernel: tpu_custom_call.1
= control target key start
LH: loop header
LB: loop body
LE: loop exit
PB: predicated region body
PF: predicated region fallthrough
CT: control target
= control target key end

     0   :  { %10 = vsyncpa [#allocation3], 0  ;;  %s3613_s0 = inlined_call_operand.hbm [shape: bf16[8192,128], index: 0, kind: input, shape index: {}]   ;;  %s3614_s1 = inlined_call_operand.hbm [shape: bf16[128,128], index: 1, kind: input, shape index: {}]   ;;  %s3615_s2 = inlined_call_operand.hbm [shape: f32[8192,128], index: 2, kind: output, shape index: {0}]   ;;  %s3616_s3 = inlined_call_operand.hbm [shape: f32[64,128], index: 3, kind: output, shape index: {1}]   ;;  %s3617_s4 = inlined_call_operand.hbm [shape: f32[64,128], index: 4, kind: output, shape index: {2}]  }
   0x1   :  { %12 = vsyncpa [#allocation3 + $0x1], 0 }
   0x2   :  { %13 = vsyncpa [#allocation6], 0 }
   0x3   :  { %14 = vsyncpa [#allocation4], 0 }
   0x4   :  { %16 = vsyncpa [#allocation4 + $0x1], 0 }
   0x5   :  { %17 = vsyncpa [#allocation9], 0 }
   0x6   :  { %19 = vsyncpa [#allocation9 + $0x1], 0  ;;  %s2781_s15 = smov 0   ;;  %s2783_s16 = smov 0  }
   0x7   :  { %s2785_s17 = smov 0   ;;  %s2787_s18 = smov 0  }
   0x8 LB: > { %s2802_s19 = sadd.s32 4294967295, %s2745_s18   ;;  %s3619_s20 = sadd.s32 4294967294, %s2745_s18   ;;  %s2745_s18 = sphi %s2787_s18, %s3688_s18   ;;  %s2741_s17 = sphi %s2785_s17, %s3687_s17   ;;  %s2737_s16 = sphi %s2783_s16, %s3686_s16   ;;  %s2733_s15 = sphi %s2781_s15, %s3685_s15  }
   0x9   : > { %p45_p0 = scmp.ne.s32.totalorder %s2737_s16, %s2733_s15  ;;  %p3618_p1 = scmp.eq.s32.totalorder %s2802_s19, 0 }
   0xa   : > { %p96_p3 = scmp.eq.s32.totalorder %s3619_s20, 7  ;;  %p2097_p5 = scmp.ge.s32.totalorder %s2745_s18, 1 }
   0xb   : > { %p2813_p4 = por %p3618_p1, %p45_p0  ;;  %p155_p7 = scmp.lt.s32.totalorder %s2745_s18, 9 }
   0xc   : > { %p2818_p6 = por %p96_p3, %p45_p0  ;;  %s2747_s24 = smov [#allocation5]  }
   0xd   : > { %s3647_s21 = scalar_select %p2813_p4, 1, 0 }
   0xe   : > { %s3648_s22 = scalar_select %p2818_p6, 1, 0 }
   0xf   : > { %p2823_p8 = pnand %p2097_p5, %p155_p7  ;;  %s167_s25 = sshll.u32 %s2747_s24, 4  ;;  %s168_s25 = int_to_ptr.vmem [resolvable:$true] %s167_s25 }
  0x10   : > { %s2836_s27 = sadd.s32 1, %s2745_s18   ;;  %s32_s28 = sadd.s32 1, %s2741_s17 }
  0x11   : > { %s3649_s23 = scalar_select %p2823_p8, 1, 0 }
  0x12   : > { %p2436_p9 = pneg %p2823_p8  ;;  %s29_s29 = ssub.s32 %s2745_s18, %s2836_s27 }
  0x13   : > { %s2578_s30 = scalar_lea.vmem %s168_s25, 1024  ;;  %p2586_p3 = scmp.lt.s32.totalorder %s168_s25, %s168_s25 }
  0x14   : > { %p2831_p10 = pnand %p2436_p9, %p3618_p1  ;;  %p2579_p12 = scmp.ne.s32.totalorder %s168_s25, %s2578_s30 }
  0x15   : > { %p2587_p5 = scmp.lt.s32.totalorder %s2578_s30, %s2578_s30 }
  0x16   : > { %p2569_p11 = pneg %p2831_p10 }
  0x17   : > { %p2588_p7 = por %p2587_p5, %p2586_p3 }
  0x18   : > { %p2581_p13 = pnand %p2579_p12, %p2569_p11 }
  0x1a   : > { %p2582_p0 = pneg %p2581_p13 }
  0x1c   : > { %p2589_p2 = pnand %p2588_p7, %p2582_p0 }
  0x1e   : > { %2592 = shalt.err (!%p2589_p2)
}
  0x1f   : > { %s2748_s5 = smov 64   ;;  %s2749_s6 = smov 4  }
  0x20   : > { %2439 = dma.hbm_to_vmem [thread:$0]  (!%p2831_p10), %s3614_s1, 1024, %s168_s25, [#allocation6], %s2748_s5, %s2748_s5, %s2749_s6  }
  0x21   : > { %p30_p2 = scmp.eq.s32.totalorder %s29_s29, 0  ;;  %p39_p9 = scmp.ne.s32.totalorder %s2741_s17, %s2737_s16 }
  0x22   : > { %p40_p11 = scmp.eq.s32.totalorder %s2745_s18, 0  ;;  %p2455_p12 = scmp.lt.s32.totalorder %s2745_s18, 8 }
  0x23   : > { %s2856_s9 = scalar_select %p30_p2, %s2741_s17, %s32_s28  }
  0x24   : > { %p41_p13 = por %p40_p11, %p39_p9  ;;  %p3651_p0 = scmp.eq.s32.totalorder %s2802_s19, 7 }
  0x25   : > { %s181_s11 = sand.u32 1, %s2741_s17   ;;  %s2190_s12 = sshll.u32 %s2745_s18, 13 }
  0x26   : > { %p2860_p3 = por %p3651_p0, %p39_p9  ;;  %s2100_s13 = sshll.u32 %s181_s11, 9 }
  0x27   : > { %s2869_s26 = scalar_lea.hbm %s3613_s0, %s2190_s12  ;;  %s185_s25 = scalar_lea.vmem [#allocation2], %s2100_s13 }
  0x28   : > { %s3652_s10 = scalar_select %p2860_p3, 1, 0 }
  0x29   : > { %s192_s28 = sshll.u32 %s185_s25, 4  ;;  %p2871_p10 = pnand %p2455_p12, %p41_p13  ;;  %s2875_s28 = int_to_ptr.vmem [resolvable:$true] %s192_s28 }
  0x2a   : > { %s2877_s30 = scalar_lea.sflag [#allocation3], %s181_s11  ;;  %s2593_s7 = scalar_lea.hbm %s2869_s26, 8192 }
  0x2b   : > { %p2594_p5 = scmp.ne.s32.totalorder %s2869_s26, %s2593_s7  ;;  %p2595_p7 = pneg %p2871_p10 }
  0x2c   : > { %s2598_s13 = scalar_lea.hbm %s3613_s0, 65536  ;;  %p2599_p11 = scmp.lt.s32.totalorder %s2869_s26, %s3613_s0 }
  0x2d   : > { %p2596_p2 = pnand %p2595_p7, %p2594_p5  ;;  %p2600_p12 = scmp.lt.s32.totalorder %s2598_s13, %s2593_s7 }
  0x2f   : > { %p2597_p9 = pneg %p2596_p2  ;;  %p2601_p13 = por %p2600_p12, %p2599_p11 }
  0x31   : > { %p2602_p0 = pnand %p2601_p13, %p2597_p9 }
  0x33   : > { %2605 = shalt.err (!%p2602_p0)
}
  0x34   : > { %s2606_s11 = scalar_lea.vmem %s2875_s28, 8192  ;;  %s2750_s25 = smov [#allocation2]  }
  0x35   : > { %p2607_p1 = scmp.ne.s32.totalorder %s2875_s28, %s2606_s11  ;;  %s2611_s20 = sshll.u32 %s2750_s25, 4  ;;  %s2612_s20 = int_to_ptr.vmem [resolvable:$false] %s2611_s20 }
  0x36   : > { %s2613_s8 = scalar_lea.vmem %s2612_s20, 16384  ;;  %p2614_p2 = scmp.lt.s32.totalorder %s2875_s28, %s2612_s20 }
  0x37   : > { %p2609_p6 = pnand %p2607_p1, %p2595_p7  ;;  %p2615_p3 = scmp.lt.s32.totalorder %s2613_s8, %s2606_s11 }
  0x39   : > { %p2610_p5 = pneg %p2609_p6  ;;  %p2616_p4 = por %p2615_p3, %p2614_p2 }
  0x3b   : > { %p2617_p8 = pnand %p2616_p4, %p2610_p5 }
  0x3d   : > { %2620 = shalt.err (!%p2617_p8)
}
  0x3e   : > { %2443 = dma.hbm_to_vmem [thread:$0]  (!%p2871_p10), %s2869_s26, 8192, %s2875_s28, %s2877_s30, %s2748_s5, %s2748_s5, %s2749_s6  }
  0x3f   : > { %p3654_p1 = scmp.ne.s32.totalorder %s3649_s23, 0 }
  0x41   : > { %204 = sbr.rel (%p3654_p1) target bundleno = 621 (0x26d), region = 28 }
  0x46   : > { %s2904_s7 = sand.u32 1, %s2737_s16   ;;  %p3655_p4 = scmp.ne.s32.totalorder %s3647_s21, 0 }
  0x47   : > { %s2104_s20 = sshll.u32 %s2904_s7, 9  ;;  %s207_s12 = scalar_lea.sflag [#allocation3], %s2904_s7 }
  0x48   : > { %s2908_s13 = scalar_lea.vmem [#allocation2], %s2104_s20 }
  0x49   : > { %2716 = dma.done.wait (%p3655_p4), %s207_s12, 8192  }
  0x4a   : > { %2718 = vsyncadd (%p3655_p4), %s207_s12, 4294959104  ;;  %p3656_p6 = scmp.eq.s32.totalorder %s2802_s19, 0 }
  0x4c   : > { %2720 = dma.done.wait (%p3656_p6), [#allocation6], 1024   ;;  %p3657_p8 = pmov %p3656_p6 }
  0x4d   : > { %v2495_v0 = vld [vmem:[#allocation5 + $0x38] sm:$0xff]   ;;  %v2496_v1 = vld [vmem:[#allocation5 + $0x30] sm:$0xff]   ;;  %v2497_v2 = vld [vmem:[#allocation5 + $0x28] sm:$0xff]   ;;  %s2106_s21 = sshll.u32 %s2904_s7, 10  ;;  %s2191_s5 = sshll.u32 %s2802_s19, 14 }
  0x4e   : > { %2722 = vsyncadd (%p3657_p8), [#allocation6], 4294966272  ;;  %2264 = vmatprep.subr.bf16.mxu0 %v2495_v0  ;;  %2408 = vmatprep.subr.bf16.mxu1 %v2495_v0  ;;  %v2498_v3 = vld [vmem:[#allocation5 + $0x20] sm:$0xff]   ;;  %v2499_v5 = vld [vmem:[#allocation5 + $0x18] sm:$0xff]   ;;  %s2983_s23 = scalar_lea.vmem [#allocation7], %s2106_s21  ;;  %s3340_s29 = scalar_lea.hbm %s3615_s2, %s2191_s5 }
  0x4f   : > { %2265 = vmatpush3.bf16.msra.mxu0 %v2495_v0  ;;  %2416 = vmatpush3.bf16.msra.mxu1 %v2495_v0  ;;  %v2503_v4 = vld [vmem:[%s2908_s13] sm:$0xff]   ;;  %v2500_v6 = vld [vmem:[#allocation5 + $0x10] sm:$0xff]   ;;  %v2501_v7 = vld [vmem:[#allocation5 + $0x8] sm:$0xff]   ;;  %s1926_s6 = sshll.u32 %s2983_s23, 4  ;;  %s1903_s30 = scalar_lea.sflag [#allocation4], %s2904_s7  ;;  %s3342_s6 = int_to_ptr.vmem [resolvable:$true] %s1926_s6 }
  0x50   : > { %2266 = vmatprep.subr.bf16.mxu0 %v2496_v1  ;;  %2409 = vmatprep.subr.bf16.mxu1 %v2496_v1  ;;  %v2502_v8 = vld [vmem:[#allocation5] sm:$0xff]   ;;  %v2504_v9 = vld [vmem:[%s2908_s13 + $0x8] sm:$0xff]   ;;  %v2505_v10 = vld [vmem:[%s2908_s13 + $0x10] sm:$0xff]   ;;  %s2621_s14 = scalar_lea.vmem %s3342_s6, 16384  ;;  %p3670_p10 = scmp.ne.s32.totalorder %s3652_s10, 0 }
  0x51   : > { %2280 = vmatprep.mubr.bf16.mxu0 %v2503_v4  ;;  %v2506_v11 = vld [vmem:[%s2908_s13 + $0x18] sm:$0xff]   ;;  %v2507_v12 = vld [vmem:[%s2908_s13 + $0x20] sm:$0xff]   ;;  %v2536_v14 = vld [vmem:[%s2908_s13 + $0x108] sm:$0xff]   ;;  %p2622_p3 = scmp.ne.s32.totalorder %s3342_s6, %s2621_s14  ;;  %s2751_s24 = smov [#allocation7]  }
  0x52   : > { %v2535_v13 = vld [vmem:[%s2908_s13 + $0x100] sm:$0xff]   ;;  %v2537_v15 = vld [vmem:[%s2908_s13 + $0x110] sm:$0xff]   ;;  %v2508_v16 = vld [vmem:[%s2908_s13 + $0x28] sm:$0xff]   ;;  %s2625_s11 = sshll.u32 %s2751_s24, 4  ;;  %s2626_s11 = int_to_ptr.vmem [resolvable:$false] %s2625_s11 }
  0x53   : > { %2267 = vmatpush3.bf16.msra.mxu0 %v2496_v1  ;;  %2417 = vmatpush3.bf16.msra.mxu1 %v2496_v1  ;;  %v2509_v17 = vld [vmem:[%s2908_s13 + $0x30] sm:$0xff]   ;;  %v2538_v18 = vld [vmem:[%s2908_s13 + $0x118] sm:$0xff]   ;;  %v2539_v19 = vld [vmem:[%s2908_s13 + $0x120] sm:$0xff]   ;;  %p2623_p7 = pnand %p2622_p3, %p3670_p10  ;;  %s2627_s25 = scalar_lea.vmem %s2626_s11, 32768 }
  0x54   : > { %2268 = vmatprep.subr.bf16.mxu0 %v2497_v2  ;;  %2410 = vmatprep.subr.bf16.mxu1 %v2497_v2  ;;  %v2510_v20 = vld [vmem:[%s2908_s13 + $0x38] sm:$0xff]   ;;  %v2511_v21 = vld [vmem:[%s2908_s13 + $0x40] sm:$0xff]   ;;  %v2540_v22 = vld [vmem:[%s2908_s13 + $0x128] sm:$0xff]   ;;  %p2628_p11 = scmp.lt.s32.totalorder %s3342_s6, %s2626_s11  ;;  %p2629_p12 = scmp.lt.s32.totalorder %s2627_s25, %s2621_s14 }
  0x55   : > { %2344 = vmatprep.mubr.bf16.mxu1 %v2535_v13  ;;  %v2541_v23 = vld [vmem:[%s2908_s13 + $0x130] sm:$0xff]   ;;  %v2512_v24 = vld [vmem:[%s2908_s13 + $0x48] sm:$0xff]   ;;  %v2542_v26 = vld [vmem:[%s2908_s13 + $0x138] sm:$0xff]   ;;  %p2624_p9 = pneg %p2623_p7 }
  0x56   : > { %v2513_v25 = vld [vmem:[%s2908_s13 + $0x50] sm:$0xff]   ;;  %v2543_v27 = vld [vmem:[%s2908_s13 + $0x140] sm:$0xff]   ;;  %v2514_v28 = vld [vmem:[%s2908_s13 + $0x58] sm:$0xff]   ;;  %p2630_p13 = por %p2629_p12, %p2628_p11 }
  0x57   : > { %2269 = vmatpush3.bf16.msra.mxu0 %v2497_v2  ;;  %2418 = vmatpush3.bf16.msra.mxu1 %v2497_v2  ;;  %v2515_v29 = vld [vmem:[%s2908_s13 + $0x60] sm:$0xff]   ;;  %v2544_v30 = vld [vmem:[%s2908_s13 + $0x148] sm:$0xff]   ;;  %v2545_v31 = vld [vmem:[%s2908_s13 + $0x150] sm:$0xff]  }
  0x58   : > { %2270 = vmatprep.subr.bf16.mxu0 %v2498_v3  ;;  %2411 = vmatprep.subr.bf16.mxu1 %v2498_v3  ;;  %v2516_v32 = vld [vmem:[%s2908_s13 + $0x68] sm:$0xff]   ;;  %v2517_v33 = vld [vmem:[%s2908_s13 + $0x70] sm:$0xff]   ;;  %v2546_v34 = vld [vmem:[%s2908_s13 + $0x158] sm:$0xff]   ;;  %p2631_p0 = pnand %p2630_p13, %p2624_p9 }
  0x59   : > { %v2547_v35 = vld [vmem:[%s2908_s13 + $0x160] sm:$0xff]   ;;  %v2518_v36 = vld [vmem:[%s2908_s13 + $0x78] sm:$0xff]   ;;  %v2548_v38 = vld [vmem:[%s2908_s13 + $0x168] sm:$0xff]  }
  0x5a   : > { %v2519_v37 = vld [vmem:[%s2908_s13 + $0x80] sm:$0xff]   ;;  %v2549_v39 = vld [vmem:[%s2908_s13 + $0x170] sm:$0xff]   ;;  %v2520_v40 = vld [vmem:[%s2908_s13 + $0x88] sm:$0xff]  }
  0x5b   : > { %2271 = vmatpush3.bf16.msra.mxu0 %v2498_v3  ;;  %2419 = vmatpush3.bf16.msra.mxu1 %v2498_v3  ;;  %v2521_v41 = vld [vmem:[%s2908_s13 + $0x90] sm:$0xff]   ;;  %v2550_v42 = vld [vmem:[%s2908_s13 + $0x178] sm:$0xff]   ;;  %v2551_v43 = vld [vmem:[%s2908_s13 + $0x180] sm:$0xff]  }
  0x5c   : > { %2272 = vmatprep.subr.bf16.mxu0 %v2499_v5  ;;  %2412 = vmatprep.subr.bf16.mxu1 %v2499_v5  ;;  %v2522_v44 = vld [vmem:[%s2908_s13 + $0x98] sm:$0xff]   ;;  %v2523_v45 = vld [vmem:[%s2908_s13 + $0xa0] sm:$0xff]   ;;  %v2552_v46 = vld [vmem:[%s2908_s13 + $0x188] sm:$0xff]  }
  0x5d   : > { %v2553_v47 = vld [vmem:[%s2908_s13 + $0x190] sm:$0xff]   ;;  %v2524_v48 = vld [vmem:[%s2908_s13 + $0xa8] sm:$0xff]   ;;  %v2554_v50 = vld [vmem:[%s2908_s13 + $0x198] sm:$0xff]  }
  0x5e   : > { %v2525_v49 = vld [vmem:[%s2908_s13 + $0xb0] sm:$0xff]   ;;  %v2555_v51 = vld [vmem:[%s2908_s13 + $0x1a0] sm:$0xff]   ;;  %v2526_v52 = vld [vmem:[%s2908_s13 + $0xb8] sm:$0xff]  }
  0x5f   : > { %2273 = vmatpush3.bf16.msra.mxu0 %v2499_v5  ;;  %2420 = vmatpush3.bf16.msra.mxu1 %v2499_v5  ;;  %v2527_v53 = vld [vmem:[%s2908_s13 + $0xc0] sm:$0xff]   ;;  %v2556_v54 = vld [vmem:[%s2908_s13 + $0x1a8] sm:$0xff]   ;;  %v2557_v55 = vld [vmem:[%s2908_s13 + $0x1b0] sm:$0xff]  }
  0x60   : > { %2274 = vmatprep.subr.bf16.mxu0 %v2500_v6  ;;  %2413 = vmatprep.subr.bf16.mxu1 %v2500_v6  ;;  %v2528_v56 = vld [vmem:[%s2908_s13 + $0xc8] sm:$0xff]   ;;  %v2529_v57 = vld [vmem:[%s2908_s13 + $0xd0] sm:$0xff]   ;;  %v2558_v58 = vld [vmem:[%s2908_s13 + $0x1b8] sm:$0xff]  }
  0x61   : > { %v2559_v59 = vld [vmem:[%s2908_s13 + $0x1c0] sm:$0xff]   ;;  %v2530_v60 = vld [vmem:[%s2908_s13 + $0xd8] sm:$0xff]   ;;  %v2560_v62 = vld [vmem:[%s2908_s13 + $0x1c8] sm:$0xff]  }
  0x62   : > { %v2531_v61 = vld [vmem:[%s2908_s13 + $0xe0] sm:$0xff]   ;;  %v2561_v63 = vld [vmem:[%s2908_s13 + $0x1d0] sm:$0xff]   ;;  %v2532_v0 = vld [vmem:[%s2908_s13 + $0xe8] sm:$0xff]  }
  0x63   : > { %2275 = vmatpush3.bf16.msra.mxu0 %v2500_v6  ;;  %2421 = vmatpush3.bf16.msra.mxu1 %v2500_v6  ;;  %v2533_v1 = vld [vmem:[%s2908_s13 + $0xf0] sm:$0xff]   ;;  %v2562_v2 = vld [vmem:[%s2908_s13 + $0x1d8] sm:$0xff]   ;;  %v2563_v3 = vld [vmem:[%s2908_s13 + $0x1e0] sm:$0xff]  }
  0x64   : > { %2276 = vmatprep.subr.bf16.mxu0 %v2501_v7  ;;  %2414 = vmatprep.subr.bf16.mxu1 %v2501_v7  ;;  %v2534_v4 = vld [vmem:[%s2908_s13 + $0xf8] sm:$0xff]   ;;  %v2564_v5 = vld [vmem:[%s2908_s13 + $0x1e8] sm:$0xff]   ;;  %v2565_v6 = vld [vmem:[%s2908_s13 + $0x1f0] sm:$0xff]  }
  0x67   : > { %2277 = vmatpush3.bf16.msra.mxu0 %v2501_v7  ;;  %2422 = vmatpush3.bf16.msra.mxu1 %v2501_v7  ;;  %v2566_v7 = vld [vmem:[%s2908_s13 + $0x1f8] sm:$0xff]  }
  0x68   : > { %2278 = vmatprep.subr.bf16.mxu0 %v2502_v8  ;;  %2415 = vmatprep.subr.bf16.mxu1 %v2502_v8 }
  0x6b   : > { %2279 = vmatpush3.bf16.msra.mxu0 %v2502_v8  ;;  %2423 = vmatpush3.bf16.msra.mxu1 %v2502_v8 }
  0x6e   : > { %2281 = vmatmul.mubr.bf16.vlgmr.msra.gmra.mxu0 %v2504_v9  ;;  %2345 = vmatmul.mubr.bf16.vlgmr.msra.gmra.mxu1 %v2536_v14 }
  0x6f   : > { %2284 = vmatprep.mubr.bf16.mxu0 %v2505_v10  ;;  %2348 = vmatprep.mubr.bf16.mxu1 %v2537_v15 }
  0x76   : > { %2285 = vmatmul.mubr.bf16.gmra.mxu0 %v2506_v11  ;;  %2349 = vmatmul.mubr.bf16.gmra.mxu1 %v2538_v18 }
  0x77   : > { %2288 = vmatprep.mubr.bf16.mxu0 %v2507_v12  ;;  %2352 = vmatprep.mubr.bf16.mxu1 %v2539_v19 }
  0x7e   : > { %2289 = vmatmul.mubr.bf16.gmra.mxu0 %v2508_v16  ;;  %2353 = vmatmul.mubr.bf16.gmra.mxu1 %v2540_v22 }
  0x7f   : > { %2292 = vmatprep.mubr.bf16.mxu0 %v2509_v17  ;;  %2356 = vmatprep.mubr.bf16.mxu1 %v2541_v23 }
  0x86   : > { %2293 = vmatmul.mubr.bf16.gmra.mxu0 %v2510_v20  ;;  %2357 = vmatmul.mubr.bf16.gmra.mxu1 %v2542_v26 }
  0x87   : > { %2296 = vmatprep.mubr.bf16.mxu0 %v2511_v21  ;;  %2360 = vmatprep.mubr.bf16.mxu1 %v2543_v27 }
  0x8e   : > { %2297 = vmatmul.mubr.bf16.gmra.mxu0 %v2512_v24  ;;  %2361 = vmatmul.mubr.bf16.gmra.mxu1 %v2544_v30 }
  0x8f   : > { %2300 = vmatprep.mubr.bf16.mxu0 %v2513_v25  ;;  %2364 = vmatprep.mubr.bf16.mxu1 %v2545_v31 }
  0x96   : > { %2301 = vmatmul.mubr.bf16.gmra.mxu0 %v2514_v28  ;;  %2365 = vmatmul.mubr.bf16.gmra.mxu1 %v2546_v34 }
  0x97   : > { %2304 = vmatprep.mubr.bf16.mxu0 %v2515_v29  ;;  %2368 = vmatprep.mubr.bf16.mxu1 %v2547_v35 }
  0x9e   : > { %2305 = vmatmul.mubr.bf16.gmra.mxu0 %v2516_v32  ;;  %2369 = vmatmul.mubr.bf16.gmra.mxu1 %v2548_v38 }
  0x9f   : > { %2308 = vmatprep.mubr.bf16.mxu0 %v2517_v33  ;;  %2372 = vmatprep.mubr.bf16.mxu1 %v2549_v39 }
  0xa6   : > { %2309 = vmatmul.mubr.bf16.gmra.mxu0 %v2518_v36  ;;  %2373 = vmatmul.mubr.bf16.gmra.mxu1 %v2550_v42 }
  0xa7   : > { %2312 = vmatprep.mubr.bf16.mxu0 %v2519_v37  ;;  %2376 = vmatprep.mubr.bf16.mxu1 %v2551_v43 }
  0xae   : > { %2313 = vmatmul.mubr.bf16.gmra.mxu0 %v2520_v40  ;;  %2377 = vmatmul.mubr.bf16.gmra.mxu1 %v2552_v46 }
  0xaf   : > { %2316 = vmatprep.mubr.bf16.mxu0 %v2521_v41  ;;  %2380 = vmatprep.mubr.bf16.mxu1 %v2553_v47 }
  0xb6   : > { %2317 = vmatmul.mubr.bf16.gmra.mxu0 %v2522_v44  ;;  %2381 = vmatmul.mubr.bf16.gmra.mxu1 %v2554_v50 }
  0xb7   : > { %2320 = vmatprep.mubr.bf16.mxu0 %v2523_v45  ;;  %2384 = vmatprep.mubr.bf16.mxu1 %v2555_v51 }
  0xbe   : > { %2321 = vmatmul.mubr.bf16.gmra.mxu0 %v2524_v48  ;;  %2385 = vmatmul.mubr.bf16.gmra.mxu1 %v2556_v54 }
  0xbf   : > { %2324 = vmatprep.mubr.bf16.mxu0 %v2525_v49  ;;  %2388 = vmatprep.mubr.bf16.mxu1 %v2557_v55 }
  0xc6   : > { %2325 = vmatmul.mubr.bf16.gmra.mxu0 %v2526_v52  ;;  %2389 = vmatmul.mubr.bf16.gmra.mxu1 %v2558_v58 }
  0xc7   : > { %2328 = vmatprep.mubr.bf16.mxu0 %v2527_v53  ;;  %2392 = vmatprep.mubr.bf16.mxu1 %v2559_v59 }
  0xce   : > { %2329 = vmatmul.mubr.bf16.gmra.mxu0 %v2528_v56  ;;  %2393 = vmatmul.mubr.bf16.gmra.mxu1 %v2560_v62 }
  0xcf   : > { %2332 = vmatprep.mubr.bf16.mxu0 %v2529_v57  ;;  %2396 = vmatprep.mubr.bf16.mxu1 %v2561_v63 }
  0xd6   : > { %2333 = vmatmul.mubr.bf16.gmra.mxu0 %v2530_v60  ;;  %2397 = vmatmul.mubr.bf16.gmra.mxu1 %v2562_v2 }
  0xd7   : > { %2336 = vmatprep.mubr.bf16.mxu0 %v2531_v61  ;;  %2400 = vmatprep.mubr.bf16.mxu1 %v2563_v3 }
  0xde   : > { %2337 = vmatmul.mubr.bf16.gmra.mxu0 %v2532_v0  ;;  %2401 = vmatmul.mubr.bf16.gmra.mxu1 %v2564_v5 }
  0xdf   : > { %2340 = vmatprep.mubr.bf16.mxu0 %v2533_v1  ;;  %2404 = vmatprep.mubr.bf16.mxu1 %v2565_v6 }
  0xe6   : > { %2341 = vmatmul.mubr.bf16.gmra.mxu0 %v2534_v4  ;;  %2405 = vmatmul.mubr.bf16.gmra.mxu1 %v2566_v7 }
 0x12e   : > { %v2282_v8 = vpop.f32.mrf.mxu0  ;;  %v2990_v19 = vpop.f32.mrf.mxu1 }
 0x12f   : > { %1375 = vst [vmem:[%s2983_s23 + $0x10] sm:$0xff] %v2282_v8  ;;  %v1636_v16 = vmul.f32 %v2282_v8, %v2282_v8  ;;  %1439 = vst [vmem:[%s2983_s23 + $0x210] sm:$0xff] %v2990_v19 }
 0x130   : > { %v862_v9 = vpop.f32.mrf.mxu0  ;;  %v2995_v24 = vpop.f32.mrf.mxu1 }
 0x131   : > { %1373 = vst [vmem:[%s2983_s23] sm:$0xff] %v862_v9  ;;  %v1634_v12 = vmul.f32 %v862_v9, %v862_v9  ;;  %1437 = vst [vmem:[%s2983_s23 + $0x200] sm:$0xff] %v2995_v24 }
 0x132   : > { %v2283_v10 = vpop.f32.mrf.mxu0  ;;  %v3000_v29 = vpop.f32.mrf.mxu1 }
 0x133   : > { %1376 = vst [vmem:[%s2983_s23 + $0x18] sm:$0xff] %v2283_v10  ;;  %v1637_v21 = vmul.f32 %v2283_v10, %v2283_v10  ;;  %1440 = vst [vmem:[%s2983_s23 + $0x218] sm:$0xff] %v3000_v29 }
 0x134   : > { %v865_v11 = vpop.f32.mrf.mxu0  ;;  %v3005_v34 = vpop.f32.mrf.mxu1 }
 0x135   : > { %1374 = vst [vmem:[%s2983_s23 + $0x8] sm:$0xff] %v865_v11  ;;  %v1501_v13 = vadd.f32 %v865_v11, %v862_v9  ;;  %v1635_v14 = vmul.f32 %v865_v11, %v865_v11  ;;  %1438 = vst [vmem:[%s2983_s23 + $0x208] sm:$0xff] %v3005_v34 }
 0x136   : > { %v2286_v15 = vpop.f32.mrf.mxu0  ;;  %v3010_v39 = vpop.f32.mrf.mxu1 }
 0x137   : > { %v1502_v17 = vadd.f32 %v2282_v8, %v1501_v13  ;;  %v1762_v18 = vadd.f32 %v1635_v14, %v1634_v12  ;;  %1379 = vst [vmem:[%s2983_s23 + $0x30] sm:$0xff] %v2286_v15  ;;  %v1640_v36 = vmul.f32 %v2286_v15, %v2286_v15  ;;  %1443 = vst [vmem:[%s2983_s23 + $0x230] sm:$0xff] %v3010_v39 }
 0x138   : > { %v878_v20 = vpop.f32.mrf.mxu0  ;;  %v3015_v44 = vpop.f32.mrf.mxu1 }
 0x139   : > { %v1503_v22 = vadd.f32 %v2283_v10, %v1502_v17  ;;  %v1763_v23 = vadd.f32 %v1762_v18, %v1636_v16  ;;  %1377 = vst [vmem:[%s2983_s23 + $0x20] sm:$0xff] %v878_v20  ;;  %v1638_v28 = vmul.f32 %v878_v20, %v878_v20  ;;  %1441 = vst [vmem:[%s2983_s23 + $0x220] sm:$0xff] %v3015_v44 }
 0x13a   : > { %v2287_v25 = vpop.f32.mrf.mxu0  ;;  %v3020_v49 = vpop.f32.mrf.mxu1 }
 0x13b   : > { %v1764_v26 = vadd.f32 %v1763_v23, %v1637_v21  ;;  %v1504_v27 = vadd.f32 %v1503_v22, %v878_v20  ;;  %1380 = vst [vmem:[%s2983_s23 + $0x38] sm:$0xff] %v2287_v25  ;;  %v1641_v41 = vmul.f32 %v2287_v25, %v2287_v25  ;;  %1444 = vst [vmem:[%s2983_s23 + $0x238] sm:$0xff] %v3020_v49 }
 0x13c   : > { %v881_v30 = vpop.f32.mrf.mxu0  ;;  %v3025_v54 = vpop.f32.mrf.mxu1 }
 0x13d   : > { %v1765_v31 = vadd.f32 %v1764_v26, %v1638_v28  ;;  %1378 = vst [vmem:[%s2983_s23 + $0x28] sm:$0xff] %v881_v30  ;;  %v1505_v32 = vadd.f32 %v1504_v27, %v881_v30  ;;  %v1639_v33 = vmul.f32 %v881_v30, %v881_v30  ;;  %1442 = vst [vmem:[%s2983_s23 + $0x228] sm:$0xff] %v3025_v54 }
 0x13e   : > { %v2290_v35 = vpop.f32.mrf.mxu0  ;;  %v3030_v59 = vpop.f32.mrf.mxu1 }
 0x13f   : > { %v1506_v37 = vadd.f32 %v2286_v15, %v1505_v32  ;;  %v1766_v38 = vadd.f32 %v1765_v31, %v1639_v33  ;;  %1383 = vst [vmem:[%s2983_s23 + $0x50] sm:$0xff] %v2290_v35  ;;  %v1644_v56 = vmul.f32 %v2290_v35, %v2290_v35  ;;  %1447 = vst [vmem:[%s2983_s23 + $0x250] sm:$0xff] %v3030_v59 }
 0x140   : > { %v894_v40 = vpop.f32.mrf.mxu0  ;;  %v3035_v0 = vpop.f32.mrf.mxu1 }
 0x141   : > { %v1767_v42 = vadd.f32 %v1766_v38, %v1640_v36  ;;  %1381 = vst [vmem:[%s2983_s23 + $0x40] sm:$0xff] %v894_v40  ;;  %v1507_v43 = vadd.f32 %v2287_v25, %v1506_v37  ;;  %v1642_v47 = vmul.f32 %v894_v40, %v894_v40  ;;  %1445 = vst [vmem:[%s2983_s23 + $0x240] sm:$0xff] %v3035_v0 }
 0x142   : > { %v2291_v45 = vpop.f32.mrf.mxu0  ;;  %v3040_v5 = vpop.f32.mrf.mxu1 }
 0x143   : > { %v1508_v46 = vadd.f32 %v1507_v43, %v894_v40  ;;  %v1768_v48 = vadd.f32 %v1767_v42, %v1641_v41  ;;  %1384 = vst [vmem:[%s2983_s23 + $0x58] sm:$0xff] %v2291_v45  ;;  %v1645_v61 = vmul.f32 %v2291_v45, %v2291_v45  ;;  %1448 = vst [vmem:[%s2983_s23 + $0x258] sm:$0xff] %v3040_v5 }
 0x144   : > { %v897_v50 = vpop.f32.mrf.mxu0  ;;  %v3045_v10 = vpop.f32.mrf.mxu1 }
 0x145   : > { %v1769_v51 = vadd.f32 %v1768_v48, %v1642_v47  ;;  %1382 = vst [vmem:[%s2983_s23 + $0x48] sm:$0xff] %v897_v50  ;;  %v1509_v52 = vadd.f32 %v1508_v46, %v897_v50  ;;  %v1643_v53 = vmul.f32 %v897_v50, %v897_v50  ;;  %1446 = vst [vmem:[%s2983_s23 + $0x248] sm:$0xff] %v3045_v10 }
 0x146   : > { %v2294_v55 = vpop.f32.mrf.mxu0  ;;  %v3050_v15 = vpop.f32.mrf.mxu1 }
 0x147   : > { %v1510_v57 = vadd.f32 %v2290_v35, %v1509_v52  ;;  %v1770_v58 = vadd.f32 %v1769_v51, %v1643_v53  ;;  %1387 = vst [vmem:[%s2983_s23 + $0x70] sm:$0xff] %v2294_v55  ;;  %v1648_v12 = vmul.f32 %v2294_v55, %v2294_v55  ;;  %1451 = vst [vmem:[%s2983_s23 + $0x270] sm:$0xff] %v3050_v15 }
 0x148   : > { %v910_v60 = vpop.f32.mrf.mxu0  ;;  %v3055_v21 = vpop.f32.mrf.mxu1 }
 0x149   : > { %v1771_v62 = vadd.f32 %v1770_v58, %v1644_v56  ;;  %1385 = vst [vmem:[%s2983_s23 + $0x60] sm:$0xff] %v910_v60  ;;  %v1511_v63 = vadd.f32 %v2291_v45, %v1510_v57  ;;  %v1646_v3 = vmul.f32 %v910_v60, %v910_v60  ;;  %1449 = vst [vmem:[%s2983_s23 + $0x260] sm:$0xff] %v3055_v21 }
 0x14a   : > { %v2295_v1 = vpop.f32.mrf.mxu0  ;;  %v3060_v27 = vpop.f32.mrf.mxu1 }
 0x14b   : > { %v1512_v2 = vadd.f32 %v1511_v63, %v910_v60  ;;  %v1772_v4 = vadd.f32 %v1771_v62, %v1645_v61  ;;  %1388 = vst [vmem:[%s2983_s23 + $0x78] sm:$0xff] %v2295_v1  ;;  %v1649_v17 = vmul.f32 %v2295_v1, %v2295_v1  ;;  %1452 = vst [vmem:[%s2983_s23 + $0x278] sm:$0xff] %v3060_v27 }
 0x14c   : > { %v913_v6 = vpop.f32.mrf.mxu0  ;;  %v3065_v33 = vpop.f32.mrf.mxu1 }
 0x14d   : > { %v1773_v7 = vadd.f32 %v1772_v4, %v1646_v3  ;;  %1386 = vst [vmem:[%s2983_s23 + $0x68] sm:$0xff] %v913_v6  ;;  %v1513_v8 = vadd.f32 %v1512_v2, %v913_v6  ;;  %v1647_v9 = vmul.f32 %v913_v6, %v913_v6  ;;  %1450 = vst [vmem:[%s2983_s23 + $0x268] sm:$0xff] %v3065_v33 }
 0x14e   : > { %v2298_v11 = vpop.f32.mrf.mxu0  ;;  %v3070_v40 = vpop.f32.mrf.mxu1 }
 0x14f   : > { %v1514_v13 = vadd.f32 %v2294_v55, %v1513_v8  ;;  %v1774_v14 = vadd.f32 %v1773_v7, %v1647_v9  ;;  %1391 = vst [vmem:[%s2983_s23 + $0x90] sm:$0xff] %v2298_v11  ;;  %v1652_v36 = vmul.f32 %v2298_v11, %v2298_v11  ;;  %1455 = vst [vmem:[%s2983_s23 + $0x290] sm:$0xff] %v3070_v40 }
 0x150   : > { %v926_v16 = vpop.f32.mrf.mxu0  ;;  %v3075_v46 = vpop.f32.mrf.mxu1 }
 0x151   : > { %v1775_v18 = vadd.f32 %v1774_v14, %v1648_v12  ;;  %1389 = vst [vmem:[%s2983_s23 + $0x80] sm:$0xff] %v926_v16  ;;  %v1515_v20 = vadd.f32 %v2295_v1, %v1514_v13  ;;  %v1650_v25 = vmul.f32 %v926_v16, %v926_v16  ;;  %1453 = vst [vmem:[%s2983_s23 + $0x280] sm:$0xff] %v3075_v46 }
 0x152   : > { %v2299_v22 = vpop.f32.mrf.mxu0  ;;  %v3080_v52 = vpop.f32.mrf.mxu1 }
 0x153   : > { %v1516_v23 = vadd.f32 %v1515_v20, %v926_v16  ;;  %v1776_v26 = vadd.f32 %v1775_v18, %v1649_v17  ;;  %1392 = vst [vmem:[%s2983_s23 + $0x98] sm:$0xff] %v2299_v22  ;;  %v1653_v42 = vmul.f32 %v2299_v22, %v2299_v22  ;;  %1456 = vst [vmem:[%s2983_s23 + $0x298] sm:$0xff] %v3080_v52 }
 0x154   : > { %v929_v28 = vpop.f32.mrf.mxu0  ;;  %v3085_v58 = vpop.f32.mrf.mxu1 }
 0x155   : > { %v1777_v30 = vadd.f32 %v1776_v26, %v1650_v25  ;;  %1390 = vst [vmem:[%s2983_s23 + $0x88] sm:$0xff] %v929_v28  ;;  %v1517_v31 = vadd.f32 %v1516_v23, %v929_v28  ;;  %v1651_v32 = vmul.f32 %v929_v28, %v929_v28  ;;  %1454 = vst [vmem:[%s2983_s23 + $0x288] sm:$0xff] %v3085_v58 }
 0x156   : > { %v2302_v35 = vpop.f32.mrf.mxu0  ;;  %v3090_v1 = vpop.f32.mrf.mxu1 }
 0x157   : > { %v1518_v37 = vadd.f32 %v2298_v11, %v1517_v31  ;;  %v1778_v38 = vadd.f32 %v1777_v30, %v1651_v32  ;;  %1395 = vst [vmem:[%s2983_s23 + $0xb0] sm:$0xff] %v2302_v35  ;;  %v1656_v61 = vmul.f32 %v2302_v35, %v2302_v35  ;;  %1459 = vst [vmem:[%s2983_s23 + $0x2b0] sm:$0xff] %v3090_v1 }
 0x158   : > { %v942_v41 = vpop.f32.mrf.mxu0  ;;  %v3095_v7 = vpop.f32.mrf.mxu1 }
 0x159   : > { %v1779_v43 = vadd.f32 %v1778_v38, %v1652_v36  ;;  %1393 = vst [vmem:[%s2983_s23 + $0xa0] sm:$0xff] %v942_v41  ;;  %v1519_v45 = vadd.f32 %v2299_v22, %v1518_v37  ;;  %v1654_v50 = vmul.f32 %v942_v41, %v942_v41  ;;  %1457 = vst [vmem:[%s2983_s23 + $0x2a0] sm:$0xff] %v3095_v7 }
 0x15a   : > { %v2303_v47 = vpop.f32.mrf.mxu0  ;;  %v3100_v13 = vpop.f32.mrf.mxu1 }
 0x15b   : > { %v1520_v48 = vadd.f32 %v1519_v45, %v942_v41  ;;  %v1780_v51 = vadd.f32 %v1779_v43, %v1653_v42  ;;  %1396 = vst [vmem:[%s2983_s23 + $0xb8] sm:$0xff] %v2303_v47  ;;  %v1657_v3 = vmul.f32 %v2303_v47, %v2303_v47  ;;  %1460 = vst [vmem:[%s2983_s23 + $0x2b8] sm:$0xff] %v3100_v13 }
 0x15c   : > { %v945_v53 = vpop.f32.mrf.mxu0  ;;  %v3105_v20 = vpop.f32.mrf.mxu1 }
 0x15d   : > { %v1781_v55 = vadd.f32 %v1780_v51, %v1654_v50  ;;  %1394 = vst [vmem:[%s2983_s23 + $0xa8] sm:$0xff] %v945_v53  ;;  %v1521_v56 = vadd.f32 %v1520_v48, %v945_v53  ;;  %v1655_v57 = vmul.f32 %v945_v53, %v945_v53  ;;  %1458 = vst [vmem:[%s2983_s23 + $0x2a8] sm:$0xff] %v3105_v20 }
 0x15e   : > { %v2306_v60 = vpop.f32.mrf.mxu0  ;;  %v3110_v28 = vpop.f32.mrf.mxu1 }
 0x15f   : > { %v1522_v62 = vadd.f32 %v2302_v35, %v1521_v56  ;;  %v1782_v63 = vadd.f32 %v1781_v55, %v1655_v57  ;;  %1399 = vst [vmem:[%s2983_s23 + $0xd0] sm:$0xff] %v2306_v60  ;;  %v1660_v23 = vmul.f32 %v2306_v60, %v2306_v60  ;;  %1463 = vst [vmem:[%s2983_s23 + $0x2d0] sm:$0xff] %v3110_v28 }
 0x160   : > { %v958_v2 = vpop.f32.mrf.mxu0  ;;  %v3115_v36 = vpop.f32.mrf.mxu1 }
 0x161   : > { %v1783_v4 = vadd.f32 %v1782_v63, %v1656_v61  ;;  %1397 = vst [vmem:[%s2983_s23 + $0xc0] sm:$0xff] %v958_v2  ;;  %v1523_v6 = vadd.f32 %v2303_v47, %v1522_v62  ;;  %v1658_v11 = vmul.f32 %v958_v2, %v958_v2  ;;  %1461 = vst [vmem:[%s2983_s23 + $0x2c0] sm:$0xff] %v3115_v36 }
 0x162   : > { %v2307_v8 = vpop.f32.mrf.mxu0  ;;  %v3120_v43 = vpop.f32.mrf.mxu1 }
 0x163   : > { %v1524_v9 = vadd.f32 %v1523_v6, %v958_v2  ;;  %v1784_v12 = vadd.f32 %v1783_v4, %v1657_v3  ;;  %1400 = vst [vmem:[%s2983_s23 + $0xd8] sm:$0xff] %v2307_v8  ;;  %v1661_v31 = vmul.f32 %v2307_v8, %v2307_v8  ;;  %1464 = vst [vmem:[%s2983_s23 + $0x2d8] sm:$0xff] %v3120_v43 }
 0x164   : > { %v961_v14 = vpop.f32.mrf.mxu0  ;;  %v3125_v51 = vpop.f32.mrf.mxu1 }
 0x165   : > { %v1785_v16 = vadd.f32 %v1784_v12, %v1658_v11  ;;  %1398 = vst [vmem:[%s2983_s23 + $0xc8] sm:$0xff] %v961_v14  ;;  %v1525_v17 = vadd.f32 %v1524_v9, %v961_v14  ;;  %v1659_v18 = vmul.f32 %v961_v14, %v961_v14  ;;  %1462 = vst [vmem:[%s2983_s23 + $0x2c8] sm:$0xff] %v3125_v51 }
 0x166   : > { %v2310_v22 = vpop.f32.mrf.mxu0 }
 0x167   : > { %v1526_v25 = vadd.f32 %v2306_v60, %v1525_v17  ;;  %v1786_v26 = vadd.f32 %v1785_v16, %v1659_v18  ;;  %1403 = vst [vmem:[%s2983_s23 + $0xf0] sm:$0xff] %v2310_v22  ;;  %v1664_v55 = vmul.f32 %v2310_v22, %v2310_v22  ;;  %v3130_v60 = vpop.f32.mrf.mxu1 }
 0x168   : > { %v974_v30 = vpop.f32.mrf.mxu0  ;;  %1467 = vst [vmem:[%s2983_s23 + $0x2f0] sm:$0xff] %v3130_v60 }
 0x169   : > { %v1787_v32 = vadd.f32 %v1786_v26, %v1660_v23  ;;  %1401 = vst [vmem:[%s2983_s23 + $0xe0] sm:$0xff] %v974_v30  ;;  %v1527_v35 = vadd.f32 %v2307_v8, %v1526_v25  ;;  %v1662_v41 = vmul.f32 %v974_v30, %v974_v30  ;;  %v3135_v3 = vpop.f32.mrf.mxu1 }
 0x16a   : > { %v2311_v37 = vpop.f32.mrf.mxu0  ;;  %1465 = vst [vmem:[%s2983_s23 + $0x2e0] sm:$0xff] %v3135_v3 }
 0x16b   : > { %v1528_v38 = vadd.f32 %v1527_v35, %v974_v30  ;;  %v1788_v42 = vadd.f32 %v1787_v32, %v1661_v31  ;;  %1404 = vst [vmem:[%s2983_s23 + $0xf8] sm:$0xff] %v2311_v37  ;;  %v1665_v62 = vmul.f32 %v2311_v37, %v2311_v37  ;;  %v3140_v11 = vpop.f32.mrf.mxu1 }
 0x16c   : > { %v977_v45 = vpop.f32.mrf.mxu0  ;;  %1468 = vst [vmem:[%s2983_s23 + $0x2f8] sm:$0xff] %v3140_v11 }
 0x16d   : > { %v1789_v47 = vadd.f32 %v1788_v42, %v1662_v41  ;;  %1402 = vst [vmem:[%s2983_s23 + $0xe8] sm:$0xff] %v977_v45  ;;  %v1529_v48 = vadd.f32 %v1528_v38, %v977_v45  ;;  %v1663_v50 = vmul.f32 %v977_v45, %v977_v45  ;;  %v3145_v18 = vpop.f32.mrf.mxu1 }
 0x16e   : > { %v2314_v53 = vpop.f32.mrf.mxu0  ;;  %1466 = vst [vmem:[%s2983_s23 + $0x2e8] sm:$0xff] %v3145_v18 }
 0x16f   : > { %v1530_v56 = vadd.f32 %v2310_v22, %v1529_v48  ;;  %v1790_v57 = vadd.f32 %v1789_v47, %v1663_v50  ;;  %1407 = vst [vmem:[%s2983_s23 + $0x110] sm:$0xff] %v2314_v53  ;;  %v1668_v23 = vmul.f32 %v2314_v53, %v2314_v53  ;;  %v3150_v30 = vpop.f32.mrf.mxu1 }
 0x170   : > { %v990_v61 = vpop.f32.mrf.mxu0  ;;  %1471 = vst [vmem:[%s2983_s23 + $0x310] sm:$0xff] %v3150_v30 }
 0x171   : > { %v1791_v63 = vadd.f32 %v1790_v57, %v1664_v55  ;;  %1405 = vst [vmem:[%s2983_s23 + $0x100] sm:$0xff] %v990_v61  ;;  %v1531_v2 = vadd.f32 %v2311_v37, %v1530_v56  ;;  %v1666_v8 = vmul.f32 %v990_v61, %v990_v61  ;;  %v3155_v38 = vpop.f32.mrf.mxu1 }
 0x172   : > { %v2315_v4 = vpop.f32.mrf.mxu0  ;;  %1469 = vst [vmem:[%s2983_s23 + $0x300] sm:$0xff] %v3155_v38 }
 0x173   : > { %v1532_v6 = vadd.f32 %v1531_v2, %v990_v61  ;;  %v1792_v9 = vadd.f32 %v1791_v63, %v1665_v62  ;;  %1408 = vst [vmem:[%s2983_s23 + $0x118] sm:$0xff] %v2315_v4  ;;  %v1669_v32 = vmul.f32 %v2315_v4, %v2315_v4  ;;  %v3160_v48 = vpop.f32.mrf.mxu1 }
 0x174   : > { %v993_v12 = vpop.f32.mrf.mxu0  ;;  %1472 = vst [vmem:[%s2983_s23 + $0x318] sm:$0xff] %v3160_v48 }
 0x175   : > { %v1793_v14 = vadd.f32 %v1792_v9, %v1666_v8  ;;  %1406 = vst [vmem:[%s2983_s23 + $0x108] sm:$0xff] %v993_v12  ;;  %v1533_v16 = vadd.f32 %v1532_v6, %v993_v12  ;;  %v1667_v17 = vmul.f32 %v993_v12, %v993_v12  ;;  %v3165_v57 = vpop.f32.mrf.mxu1 }
 0x176   : > { %v2318_v22 = vpop.f32.mrf.mxu0  ;;  %1470 = vst [vmem:[%s2983_s23 + $0x308] sm:$0xff] %v3165_v57 }
 0x177   : > { %v1534_v25 = vadd.f32 %v2314_v53, %v1533_v16  ;;  %v1794_v26 = vadd.f32 %v1793_v14, %v1667_v17  ;;  %1411 = vst [vmem:[%s2983_s23 + $0x130] sm:$0xff] %v2318_v22  ;;  %v1672_v62 = vmul.f32 %v2318_v22, %v2318_v22 }
 0x178   : > { %v1006_v31 = vpop.f32.mrf.mxu0 }
 0x179   : > { %v1795_v35 = vadd.f32 %v1794_v26, %v1668_v23  ;;  %1409 = vst [vmem:[%s2983_s23 + $0x120] sm:$0xff] %v1006_v31  ;;  %v1535_v37 = vadd.f32 %v2315_v4, %v1534_v25  ;;  %v1670_v45 = vmul.f32 %v1006_v31, %v1006_v31  ;;  %v3170_v4 = vpop.f32.mrf.mxu1 }
 0x17a   : > { %v2319_v41 = vpop.f32.mrf.mxu0  ;;  %1475 = vst [vmem:[%s2983_s23 + $0x330] sm:$0xff] %v3170_v4 }
 0x17b   : > { %v1536_v42 = vadd.f32 %v1535_v37, %v1006_v31  ;;  %v1796_v47 = vadd.f32 %v1795_v35, %v1669_v32  ;;  %1412 = vst [vmem:[%s2983_s23 + $0x138] sm:$0xff] %v2319_v41  ;;  %v1673_v8 = vmul.f32 %v2319_v41, %v2319_v41  ;;  %v3175_v14 = vpop.f32.mrf.mxu1 }
 0x17c   : > { %v1009_v50 = vpop.f32.mrf.mxu0  ;;  %1473 = vst [vmem:[%s2983_s23 + $0x320] sm:$0xff] %v3175_v14 }
 0x17d   : > { %v1797_v53 = vadd.f32 %v1796_v47, %v1670_v45  ;;  %1410 = vst [vmem:[%s2983_s23 + $0x128] sm:$0xff] %v1009_v50  ;;  %v1537_v55 = vadd.f32 %v1536_v42, %v1009_v50  ;;  %v1671_v56 = vmul.f32 %v1009_v50, %v1009_v50  ;;  %v3180_v25 = vpop.f32.mrf.mxu1 }
 0x17e   : > { %v2322_v61 = vpop.f32.mrf.mxu0  ;;  %1476 = vst [vmem:[%s2983_s23 + $0x338] sm:$0xff] %v3180_v25 }
 0x17f   : > { %v1538_v63 = vadd.f32 %v2318_v22, %v1537_v55  ;;  %v1798_v2 = vadd.f32 %v1797_v53, %v1671_v56  ;;  %1415 = vst [vmem:[%s2983_s23 + $0x150] sm:$0xff] %v2322_v61  ;;  %v3185_v37 = vpop.f32.mrf.mxu1  ;;  %v1676_v42 = vmul.f32 %v2322_v61, %v2322_v61 }
 0x180   : > { %v1022_v6 = vpop.f32.mrf.mxu0  ;;  %1474 = vst [vmem:[%s2983_s23 + $0x328] sm:$0xff] %v3185_v37 }
 0x181   : > { %v1799_v9 = vadd.f32 %v1798_v2, %v1672_v62  ;;  %1413 = vst [vmem:[%s2983_s23 + $0x140] sm:$0xff] %v1022_v6  ;;  %v1539_v12 = vadd.f32 %v2319_v41, %v1538_v63  ;;  %v1674_v22 = vmul.f32 %v1022_v6, %v1022_v6  ;;  %v3190_v50 = vpop.f32.mrf.mxu1 }
 0x182   : > { %v2323_v16 = vpop.f32.mrf.mxu0  ;;  %1479 = vst [vmem:[%s2983_s23 + $0x350] sm:$0xff] %v3190_v50 }
 0x183   : > { %v1540_v17 = vadd.f32 %v1539_v12, %v1022_v6  ;;  %v1800_v23 = vadd.f32 %v1799_v9, %v1673_v8  ;;  %1416 = vst [vmem:[%s2983_s23 + $0x158] sm:$0xff] %v2323_v16  ;;  %v1677_v55 = vmul.f32 %v2323_v16, %v2323_v16  ;;  %v3195_v63 = vpop.f32.mrf.mxu1 }
 0x184   : > { %v1025_v26 = vpop.f32.mrf.mxu0  ;;  %1477 = vst [vmem:[%s2983_s23 + $0x340] sm:$0xff] %v3195_v63 }
 0x185   : > { %v1801_v31 = vadd.f32 %v1800_v23, %v1674_v22  ;;  %1414 = vst [vmem:[%s2983_s23 + $0x148] sm:$0xff] %v1025_v26  ;;  %v1541_v32 = vadd.f32 %v1540_v17, %v1025_v26  ;;  %v1675_v35 = vmul.f32 %v1025_v26, %v1025_v26  ;;  %v3200_v9 = vpop.f32.mrf.mxu1 }
 0x186   : > { %v2326_v41 = vpop.f32.mrf.mxu0  ;;  %1480 = vst [vmem:[%s2983_s23 + $0x358] sm:$0xff] %v3200_v9 }
 0x187   : > { %v1542_v45 = vadd.f32 %v2322_v61, %v1541_v32  ;;  %v1802_v47 = vadd.f32 %v1801_v31, %v1675_v35  ;;  %1419 = vst [vmem:[%s2983_s23 + $0x170] sm:$0xff] %v2326_v41  ;;  %v3205_v23 = vpop.f32.mrf.mxu1  ;;  %v1680_v31 = vmul.f32 %v2326_v41, %v2326_v41 }
 0x188   : > { %v1038_v53 = vpop.f32.mrf.mxu0  ;;  %1478 = vst [vmem:[%s2983_s23 + $0x348] sm:$0xff] %v3205_v23 }
 0x189   : > { %v1803_v56 = vadd.f32 %v1802_v47, %v1676_v42  ;;  %1417 = vst [vmem:[%s2983_s23 + $0x160] sm:$0xff] %v1038_v53  ;;  %v1543_v62 = vadd.f32 %v2323_v16, %v1542_v45  ;;  %v1678_v6 = vmul.f32 %v1038_v53, %v1038_v53  ;;  %v3210_v42 = vpop.f32.mrf.mxu1 }
 0x18a   : > { %v2327_v2 = vpop.f32.mrf.mxu0  ;;  %1483 = vst [vmem:[%s2983_s23 + $0x370] sm:$0xff] %v3210_v42 }
 0x18b   : > { %v1544_v61 = vadd.f32 %v1543_v62, %v1038_v53  ;;  %v1804_v8 = vadd.f32 %v1803_v56, %v1677_v55  ;;  %1420 = vst [vmem:[%s2983_s23 + $0x178] sm:$0xff] %v2327_v2  ;;  %v1681_v47 = vmul.f32 %v2327_v2, %v2327_v2  ;;  %v3215_v56 = vpop.f32.mrf.mxu1 }
 0x18c   : > { %v1041_v12 = vpop.f32.mrf.mxu0  ;;  %1481 = vst [vmem:[%s2983_s23 + $0x360] sm:$0xff] %v3215_v56 }
 0x18d   : > { %v1805_v17 = vadd.f32 %v1804_v8, %v1678_v6  ;;  %1418 = vst [vmem:[%s2983_s23 + $0x168] sm:$0xff] %v1041_v12  ;;  %v1545_v16 = vadd.f32 %v1544_v61, %v1041_v12  ;;  %v1679_v22 = vmul.f32 %v1041_v12, %v1041_v12  ;;  %v3220_v8 = vpop.f32.mrf.mxu1 }
 0x18e   : > { %v2330_v26 = vpop.f32.mrf.mxu0  ;;  %3658 = vst [vmem:[#allocation15_spill] sm:$0xff] %v3220_v8  ;;  %1484 = vst [vmem:[%s2983_s23 + $0x378] sm:$0xff] %v3220_v8 }
 0x18f   : > { %v1546_v32 = vadd.f32 %v2326_v41, %v1545_v16  ;;  %v1806_v35 = vadd.f32 %v1805_v17, %v1679_v22  ;;  %1423 = vst [vmem:[%s2983_s23 + $0x190] sm:$0xff] %v2330_v26  ;;  %v3225_v22 = vpop.f32.mrf.mxu1 }
 0x190   : > { %v1054_v45 = vpop.f32.mrf.mxu0  ;;  %1482 = vst [vmem:[%s2983_s23 + $0x368] sm:$0xff] %v3225_v22 }
 0x191   : > { %v1807_v53 = vadd.f32 %v1806_v35, %v1680_v31  ;;  %1421 = vst [vmem:[%s2983_s23 + $0x180] sm:$0xff] %v1054_v45  ;;  %v1547_v55 = vadd.f32 %v2327_v2, %v1546_v32  ;;  %v1682_v61 = vmul.f32 %v1054_v45, %v1054_v45  ;;  %v1684_v32 = vmul.f32 %v2330_v26, %v2330_v26 }
 0x192   : > { %v2331_v62 = vpop.f32.mrf.mxu0 }
 0x193   : > { %v1548_v41 = vadd.f32 %v1547_v55, %v1054_v45  ;;  %v1808_v6 = vadd.f32 %v1807_v53, %v1681_v47  ;;  %1424 = vst [vmem:[%s2983_s23 + $0x198] sm:$0xff] %v2331_v62  ;;  %v3230_v47 = vpop.f32.mrf.mxu1  ;;  %v1685_v55 = vmul.f32 %v2331_v62, %v2331_v62 }
 0x194   : > { %v1057_v12 = vpop.f32.mrf.mxu0  ;;  %3659 = vst [vmem:[#allocation16_spill] sm:$0xff] %v3230_v47  ;;  %1487 = vst [vmem:[%s2983_s23 + $0x390] sm:$0xff] %v3230_v47 }
 0x195   : > { %v1809_v17 = vadd.f32 %v1808_v6, %v1682_v61  ;;  %1422 = vst [vmem:[%s2983_s23 + $0x188] sm:$0xff] %v1057_v12  ;;  %v1549_v2 = vadd.f32 %v1548_v41, %v1057_v12  ;;  %v1683_v16 = vmul.f32 %v1057_v12, %v1057_v12  ;;  %v3235_v6 = vpop.f32.mrf.mxu1 }
 0x196   : > { %v2334_v31 = vpop.f32.mrf.mxu0  ;;  %3660 = vst [vmem:[#allocation17_spill] sm:$0xff] %v3235_v6  ;;  %1485 = vst [vmem:[%s2983_s23 + $0x380] sm:$0xff] %v3235_v6 }
 0x197   : > { %v1550_v35 = vadd.f32 %v2330_v26, %v1549_v2  ;;  %v1810_v45 = vadd.f32 %v1809_v17, %v1683_v16  ;;  %1427 = vst [vmem:[%s2983_s23 + $0x1b0] sm:$0xff] %v2334_v31  ;;  %v3240_v16 = vpop.f32.mrf.mxu1 }
 0x198   : > { %v1070_v53 = vpop.f32.mrf.mxu0  ;;  %3661 = vst [vmem:[#allocation18_spill] sm:$0xff] %v3240_v16  ;;  %1488 = vst [vmem:[%s2983_s23 + $0x398] sm:$0xff] %v3240_v16 }
 0x199   : > { %v1811_v41 = vadd.f32 %v1810_v45, %v1684_v32  ;;  %1425 = vst [vmem:[%s2983_s23 + $0x1a0] sm:$0xff] %v1070_v53  ;;  %v1551_v61 = vadd.f32 %v2331_v62, %v1550_v35  ;;  %v1686_v17 = vmul.f32 %v1070_v53, %v1070_v53  ;;  %v3245_v45 = vpop.f32.mrf.mxu1 }
 0x19a   : > { %v2335_v12 = vpop.f32.mrf.mxu0  ;;  %3662 = vst [vmem:[#allocation19_spill] sm:$0xff] %v3245_v45  ;;  %1486 = vst [vmem:[%s2983_s23 + $0x388] sm:$0xff] %v3245_v45 }
 0x19b   : > { %v1552_v26 = vadd.f32 %v1551_v61, %v1070_v53  ;;  %v1812_v2 = vadd.f32 %v1811_v41, %v1685_v55  ;;  %1428 = vst [vmem:[%s2983_s23 + $0x1b8] sm:$0xff] %v2335_v12  ;;  %v1688_v53 = vmul.f32 %v2334_v31, %v2334_v31  ;;  %v3250_v61 = vpop.f32.mrf.mxu1 }
 0x19c   : > { %v1073_v47 = vpop.f32.mrf.mxu0  ;;  %3663 = vst [vmem:[#allocation20_spill] sm:$0xff] %v3250_v61  ;;  %1491 = vst [vmem:[%s2983_s23 + $0x3b0] sm:$0xff] %v3250_v61 }
 0x19d   : > { %v1813_v32 = vadd.f32 %v1812_v2, %v1686_v17  ;;  %1426 = vst [vmem:[%s2983_s23 + $0x1a8] sm:$0xff] %v1073_v47  ;;  %v1553_v62 = vadd.f32 %v1552_v26, %v1073_v47  ;;  %v1687_v35 = vmul.f32 %v1073_v47, %v1073_v47  ;;  %v1689_v26 = vmul.f32 %v2335_v12, %v2335_v12  ;;  %v3255_v2 = vpop.f32.mrf.mxu1 }
 0x19e   : > { %v2338_v6 = vpop.f32.mrf.mxu0  ;;  %3664 = vst [vmem:[#allocation21_spill] sm:$0xff] %v3255_v2  ;;  %1489 = vst [vmem:[%s2983_s23 + $0x3a0] sm:$0xff] %v3255_v2 }
 0x19f   : > { %v1554_v55 = vadd.f32 %v2334_v31, %v1553_v62  ;;  %v1814_v41 = vadd.f32 %v1813_v32, %v1687_v35  ;;  %1431 = vst [vmem:[%s2983_s23 + $0x1d0] sm:$0xff] %v2338_v6  ;;  %v3260_v35 = vpop.f32.mrf.mxu1 }
 0x1a0   : > { %v1086_v16 = vpop.f32.mrf.mxu0  ;;  %3665 = vst [vmem:[#allocation22_spill] sm:$0xff] %v3260_v35  ;;  %1492 = vst [vmem:[%s2983_s23 + $0x3b8] sm:$0xff] %v3260_v35 }
 0x1a1   : > { %v1815_v47 = vadd.f32 %v1814_v41, %v1688_v53  ;;  %1429 = vst [vmem:[%s2983_s23 + $0x1c0] sm:$0xff] %v1086_v16  ;;  %v1555_v17 = vadd.f32 %v2335_v12, %v1554_v55  ;;  %v1690_v32 = vmul.f32 %v1086_v16, %v1086_v16  ;;  %v3265_v41 = vpop.f32.mrf.mxu1 }
 0x1a2   : > { %v2339_v45 = vpop.f32.mrf.mxu0  ;;  %3666 = vst [vmem:[#allocation23_spill] sm:$0xff] %v3265_v41  ;;  %1490 = vst [vmem:[%s2983_s23 + $0x3a8] sm:$0xff] %v3265_v41 }
 0x1a3   : > { %v1556_v31 = vadd.f32 %v1555_v17, %v1086_v16  ;;  %v1816_v62 = vadd.f32 %v1815_v47, %v1689_v26  ;;  %1432 = vst [vmem:[%s2983_s23 + $0x1d8] sm:$0xff] %v2339_v45  ;;  %v1692_v16 = vmul.f32 %v2338_v6, %v2338_v6  ;;  %v3270_v17 = vpop.f32.mrf.mxu1 }
 0x1a4   : > { %v1089_v61 = vpop.f32.mrf.mxu0  ;;  %3667 = vst [vmem:[#allocation24_spill] sm:$0xff] %v3270_v17  ;;  %1495 = vst [vmem:[%s2983_s23 + $0x3d0] sm:$0xff] %v3270_v17 }
 0x1a5   : > { %v1817_v53 = vadd.f32 %v1816_v62, %v1690_v32  ;;  %1430 = vst [vmem:[%s2983_s23 + $0x1c8] sm:$0xff] %v1089_v61  ;;  %v1557_v12 = vadd.f32 %v1556_v31, %v1089_v61  ;;  %v1691_v55 = vmul.f32 %v1089_v61, %v1089_v61  ;;  %v1693_v31 = vmul.f32 %v2339_v45, %v2339_v45  ;;  %v3275_v62 = vpop.f32.mrf.mxu1 }
 0x1a6   : > { %v2342_v2 = vpop.f32.mrf.mxu0  ;;  %3668 = vst [vmem:[#allocation25_spill] sm:$0xff] %v3275_v62  ;;  %1493 = vst [vmem:[%s2983_s23 + $0x3c0] sm:$0xff] %v3275_v62 }
 0x1a7   : > { %v1558_v26 = vadd.f32 %v2338_v6, %v1557_v12  ;;  %v1818_v47 = vadd.f32 %v1817_v53, %v1691_v55  ;;  %1435 = vst [vmem:[%s2983_s23 + $0x1f0] sm:$0xff] %v2342_v2  ;;  %v3280_v55 = vpop.f32.mrf.mxu1 }
 0x1a8   : > { %v1102_v35 = vpop.f32.mrf.mxu0  ;;  %3669 = vst [vmem:[#allocation26_spill] sm:$0xff] %v3280_v55  ;;  %1496 = vst [vmem:[%s2983_s23 + $0x3d8] sm:$0xff] %v3280_v55 }
 0x1a9   : > { %v1819_v61 = vadd.f32 %v1818_v47, %v1692_v16  ;;  %1433 = vst [vmem:[%s2983_s23 + $0x1e0] sm:$0xff] %v1102_v35  ;;  %v1559_v32 = vadd.f32 %v2339_v45, %v1558_v26  ;;  %v1694_v53 = vmul.f32 %v1102_v35, %v1102_v35  ;;  %v3285_v47 = vpop.f32.mrf.mxu1 }
 0x1aa   : > { %v2343_v41 = vpop.f32.mrf.mxu0  ;;  %1494 = vst [vmem:[%s2983_s23 + $0x3c8] sm:$0xff] %v3285_v47 }
 0x1ab   : > { %v1560_v6 = vadd.f32 %v1559_v32, %v1102_v35  ;;  %v1820_v12 = vadd.f32 %v1819_v61, %v1693_v31  ;;  %1436 = vst [vmem:[%s2983_s23 + $0x1f8] sm:$0xff] %v2343_v41  ;;  %v1696_v32 = vmul.f32 %v2342_v2, %v2342_v2  ;;  %v3289_v31 = vpop.f32.mrf.mxu1  ;;  %v1697_v61 = vmul.f32 %v2343_v41, %v2343_v41 }
 0x1ac   : > { %v1105_v8 = vpop.f32.mrf.mxu0  ;;  %1499 = vst [vmem:[%s2983_s23 + $0x3f0] sm:$0xff] %v3289_v31 }
 0x1ad   : > { %v1821_v16 = vadd.f32 %v1820_v12, %v1694_v53  ;;  %1434 = vst [vmem:[%s2983_s23 + $0x1e8] sm:$0xff] %v1105_v8  ;;  %v1561_v45 = vadd.f32 %v1560_v6, %v1105_v8  ;;  %v1695_v26 = vmul.f32 %v1105_v8, %v1105_v8  ;;  %v3293_v53 = vpop.f32.mrf.mxu1  ;;  %v1698_v8 = vmul.f32 %v2995_v24, %v2995_v24 }
 0x1ae   : > { %1497 = vst [vmem:[%s2983_s23 + $0x3e0] sm:$0xff] %v3293_v53 }
 0x1af   : > { %v1562_v35 = vadd.f32 %v2342_v2, %v1561_v45  ;;  %v1822_v17 = vadd.f32 %v1821_v16, %v1695_v26  ;;  %v3300_v2 = vpop.f32.mrf.mxu1  ;;  %v1700_v26 = vmul.f32 %v2990_v19, %v2990_v19 }
 0x1b0   : > { %1500 = vst [vmem:[%s2983_s23 + $0x3f8] sm:$0xff] %v3300_v2 }
 0x1b1   : > { %v1563_v55 = vadd.f32 %v2343_v41, %v1562_v35  ;;  %v1823_v62 = vadd.f32 %v1822_v17, %v1696_v32  ;;  %v1699_v41 = vmul.f32 %v3005_v34, %v3005_v34  ;;  %v3307_v17 = vpop.f32.mrf.mxu1 }
 0x1b2   : > { %1498 = vst [vmem:[%s2983_s23 + $0x3e8] sm:$0xff] %v3307_v17 }
 0x1b3   : > { %v1564_v6 = vadd.f32 %v1563_v55, %v2995_v24  ;;  %v1824_v12 = vadd.f32 %v1823_v62, %v1697_v61  ;;  %v1701_v55 = vmul.f32 %v3000_v29, %v3000_v29 }
 0x1b5   : > { %v1825_v16 = vadd.f32 %v1824_v12, %v1698_v8  ;;  %v1565_v45 = vadd.f32 %v1564_v6, %v3005_v34  ;;  %v1702_v34 = vmul.f32 %v3015_v44, %v3015_v44 }
 0x1b7   : > { %v1566_v24 = vadd.f32 %v2990_v19, %v1565_v45  ;;  %v1826_v62 = vadd.f32 %v1825_v16, %v1699_v41  ;;  %v1703_v19 = vmul.f32 %v3025_v54, %v3025_v54  ;;  %v1704_v16 = vmul.f32 %v3010_v39, %v3010_v39 }
 0x1b8   : > { %v1705_v41 = vmul.f32 %v3020_v49, %v3020_v49 }
 0x1b9   : > { %v1827_v32 = vadd.f32 %v1826_v62, %v1700_v26  ;;  %v1567_v35 = vadd.f32 %v3000_v29, %v1566_v24  ;;  %v1706_v62 = vmul.f32 %v3035_v0, %v3035_v0 }
 0x1bb   : > { %v1568_v61 = vadd.f32 %v1567_v35, %v3015_v44  ;;  %v1828_v8 = vadd.f32 %v1827_v32, %v1701_v55  ;;  %v1707_v32 = vmul.f32 %v3045_v10, %v3045_v10 }
 0x1bd   : > { %v1829_v6 = vadd.f32 %v1828_v8, %v1702_v34  ;;  %v1569_v12 = vadd.f32 %v1568_v61, %v3025_v54 }
 0x1bf   : > { %v1570_v45 = vadd.f32 %v3010_v39, %v1569_v12  ;;  %v1830_v29 = vadd.f32 %v1829_v6, %v1703_v19 }
 0x1c1   : > { %v1831_v26 = vadd.f32 %v1830_v29, %v1704_v16  ;;  %v1571_v44 = vadd.f32 %v3020_v49, %v1570_v45  ;;  %v1708_v49 = vmul.f32 %v3030_v59, %v3030_v59 }
 0x1c3   : > { %v1572_v24 = vadd.f32 %v1571_v44, %v3035_v0  ;;  %v1832_v54 = vadd.f32 %v1831_v26, %v1705_v41 }
 0x1c5   : > { %v1833_v55 = vadd.f32 %v1832_v54, %v1706_v62  ;;  %v1573_v39 = vadd.f32 %v1572_v24, %v3045_v10 }
 0x1c7   : > { %v1574_v0 = vadd.f32 %v3030_v59, %v1573_v39  ;;  %v1834_v35 = vadd.f32 %v1833_v55, %v1707_v32 }
 0x1c8   : > { %2634 = shalt.err (!%p2631_p0)
}
 0x1c9   : > { %s2635_s8 = scalar_lea.hbm %s3340_s29, 16384  ;;  %s2639_s13 = scalar_lea.hbm %s3615_s2, 131072 }
 0x1ca   : > { %p2636_p5 = scmp.ne.s32.totalorder %s3340_s29, %s2635_s8  ;;  %p2640_p4 = scmp.lt.s32.totalorder %s3340_s29, %s3615_s2 }
 0x1cb   : > { %p2641_p6 = scmp.lt.s32.totalorder %s2639_s13, %s2635_s8 }
 0x1cc   : > { %p2637_p2 = pnand %p2636_p5, %p3670_p10 }
 0x1cd   : > { %p2642_p8 = por %p2641_p6, %p2640_p4 }
 0x1ce   : > { %p2638_p1 = pneg %p2637_p2 }
 0x1d0   : > { %p2643_p3 = pnand %p2642_p8, %p2638_p1 }
 0x1d2   : > { %2646 = shalt.err (!%p2643_p3)
}
 0x1d3   : > { %s2752_s5 = smov 128   ;;  %s2753_s26 = smov 8   ;;  %v1709_v59 = vmul.f32 %v3040_v5, %v3040_v5  ;;  %v1835_v10 = vadd.f32 %v1834_v35, %v1708_v49  ;;  %v1575_v61 = vadd.f32 %v3040_v5, %v1574_v0  ;;  %v1710_v8 = vmul.f32 %v3055_v21, %v3055_v21 }
 0x1d4   : > { %2430 = dma.vmem_to_hbm [thread:$0]  (%p3670_p10), %s3342_s6, 16384, %s3340_s29, %s1903_s30, %s2752_s5, %s2752_s5, %s2753_s26   ;;  %v1711_v16 = vmul.f32 %v3065_v33, %v3065_v33  ;;  %v1712_v45 = vmul.f32 %v3050_v15, %v3050_v15  ;;  %v1713_v5 = vmul.f32 %v3060_v27, %v3060_v27  ;;  %v1714_v24 = vmul.f32 %v3075_v46, %v3075_v46 }
 0x1d5   : > { %v1576_v34 = vadd.f32 %v1575_v61, %v3055_v21  ;;  %v1836_v6 = vadd.f32 %v1835_v10, %v1709_v59  ;;  %v1715_v55 = vmul.f32 %v3085_v58, %v3085_v58  ;;  %v1718_v35 = vmul.f32 %v3095_v7, %v3095_v7  ;;  %s2107_s6 = sshll.u32 %s2904_s7, 3  ;;  %s1907_s28 = sand.u32 1, %s2802_s19  }
 0x1d6   : > { %v1719_v61 = vmul.f32 %v3105_v20, %v3105_v20  ;;  %s2186_s29 = sshll.u32 %s2802_s19, 7  ;;  %s241_s30 = scalar_lea.vmem [#allocation8], %s2107_s6 }
 0x1d7   : > { %v1837_v12 = vadd.f32 %v1836_v6, %v1710_v8  ;;  %v1577_v19 = vadd.f32 %v1576_v34, %v3065_v33  ;;  %s1942_s14 = sshll.u32 %s241_s30, 4  ;;  %s3532_s24 = scalar_lea.vmem [#allocation10], %s2107_s6  ;;  %s3540_s14 = int_to_ptr.vmem [resolvable:$true] %s1942_s14 }
 0x1d8   : > { %s1955_s11 = sshll.u32 %s3532_s24, 4  ;;  %s3538_s8 = scalar_lea.hbm %s3616_s3, %s2186_s29  ;;  %s3547_s11 = int_to_ptr.vmem [resolvable:$true] %s1955_s11 }
 0x1d9   : > { %v1578_v29 = vadd.f32 %v3050_v15, %v1577_v19  ;;  %v1838_v41 = vadd.f32 %v1837_v12, %v1711_v16  ;;  %v1716_v15 = vmul.f32 %v3070_v40, %v3070_v40  ;;  %v1722_v19 = vmul.f32 %v3115_v36, %v3115_v36  ;;  %s3545_s12 = scalar_lea.hbm %s3617_s4, %s2186_s29  ;;  %s3549_s13 = scalar_lea.sflag [#allocation9], %s1907_s28 }
 0x1da   : > { %s2647_s21 = scalar_lea.vmem %s3540_s14, 128  ;;  %s2754_s23 = smov [#allocation8]  }
 0x1db   : > { %v1839_v26 = vadd.f32 %v1838_v41, %v1712_v45  ;;  %v1579_v44 = vadd.f32 %v3060_v27, %v1578_v29  ;;  %v1717_v27 = vmul.f32 %v3080_v52, %v3080_v52  ;;  %v1723_v29 = vmul.f32 %v3125_v51, %v3125_v51  ;;  %p2648_p7 = scmp.ne.s32.totalorder %s3540_s14, %s2647_s21  ;;  %s2651_s5 = sshll.u32 %s2754_s23, 4  ;;  %s2652_s5 = int_to_ptr.vmem [resolvable:$false] %s2651_s5 }
 0x1dc   : > { %s2653_s26 = scalar_lea.vmem %s2652_s5, 256  ;;  %p2654_p12 = scmp.lt.s32.totalorder %s3540_s14, %s2652_s5 }
 0x1dd   : > { %v1580_v21 = vadd.f32 %v1579_v44, %v3075_v46  ;;  %v1840_v62 = vadd.f32 %v1839_v26, %v1713_v5  ;;  %p2649_p9 = pnand %p2648_p7, %p3670_p10  ;;  %p2655_p13 = scmp.lt.s32.totalorder %s2653_s26, %s2647_s21 }
 0x1df   : > { %v1841_v54 = vadd.f32 %v1840_v62, %v1714_v24  ;;  %v1581_v33 = vadd.f32 %v1580_v21, %v3085_v58  ;;  %v1726_v21 = vmul.f32 %v3135_v3, %v3135_v3  ;;  %p2650_p11 = pneg %p2649_p9  ;;  %p2656_p0 = por %p2655_p13, %p2654_p12 }
 0x1e1   : > { %v1582_v39 = vadd.f32 %v3070_v40, %v1581_v33  ;;  %v1842_v32 = vadd.f32 %v1841_v54, %v1715_v55  ;;  %v1720_v40 = vmul.f32 %v3090_v1, %v3090_v1  ;;  %v1727_v54 = vmul.f32 %v3145_v18, %v3145_v18  ;;  %p2657_p5 = pnand %p2656_p0, %p2650_p11 }
 0x1e3   : > { %v1843_v49 = vadd.f32 %v1842_v32, %v1716_v15  ;;  %v1583_v0 = vadd.f32 %v3080_v52, %v1582_v39  ;;  %v1721_v52 = vmul.f32 %v3100_v13, %v3100_v13  ;;  %v1730_v32 = vmul.f32 %v3155_v38, %v3155_v38 }
 0x1e5   : > { %v1584_v46 = vadd.f32 %v1583_v0, %v3095_v7  ;;  %v1844_v59 = vadd.f32 %v1843_v49, %v1717_v27  ;;  %v1731_v0 = vmul.f32 %v3165_v57, %v3165_v57 }
 0x1e7   : > { %v1845_v10 = vadd.f32 %v1844_v59, %v1718_v35  ;;  %v1585_v58 = vadd.f32 %v1584_v46, %v3105_v20 }
 0x1e9   : > { %v1586_v34 = vadd.f32 %v3090_v1, %v1585_v58  ;;  %v1846_v8 = vadd.f32 %v1845_v10, %v1719_v61  ;;  %v1724_v1 = vmul.f32 %v3110_v28, %v3110_v28  ;;  %v1734_v58 = vmul.f32 %v3175_v14, %v3175_v14 }
 0x1eb   : > { %v1847_v6 = vadd.f32 %v1846_v8, %v1720_v40  ;;  %v1587_v12 = vadd.f32 %v3100_v13, %v1586_v34  ;;  %v1725_v13 = vmul.f32 %v3120_v43, %v3120_v43  ;;  %v1735_v34 = vmul.f32 %v3185_v37, %v3185_v37 }
 0x1ed   : > { %v1588_v7 = vadd.f32 %v1587_v12, %v3115_v36  ;;  %v1848_v16 = vadd.f32 %v1847_v6, %v1721_v52 }
 0x1ef   : > { %v1849_v45 = vadd.f32 %v1848_v16, %v1722_v19  ;;  %v1589_v20 = vadd.f32 %v1588_v7, %v3125_v51  ;;  %v1738_v7 = vmul.f32 %v3195_v63, %v3195_v63 }
 0x1f1   : > { %v1590_v41 = vadd.f32 %v3110_v28, %v1589_v20  ;;  %v1850_v5 = vadd.f32 %v1849_v45, %v1723_v29  ;;  %v1728_v28 = vmul.f32 %v3130_v60, %v3130_v60  ;;  %v1739_v45 = vmul.f32 %v3205_v23, %v3205_v23 }
 0x1f3   : > { %v1851_v26 = vadd.f32 %v1850_v5, %v1724_v1  ;;  %v1591_v44 = vadd.f32 %v3120_v43, %v1590_v41  ;;  %v1729_v43 = vmul.f32 %v3140_v11, %v3140_v11  ;;  %v1742_v5 = vmul.f32 %v3215_v56, %v3215_v56 }
 0x1f5   : > { %v1592_v36 = vadd.f32 %v1591_v44, %v3135_v3  ;;  %v1852_v24 = vadd.f32 %v1851_v26, %v1725_v13  ;;  %v1743_v44 = vmul.f32 %v3225_v22, %v3225_v22 }
 0x1f7   : > { %v1853_v62 = vadd.f32 %v1852_v24, %v1726_v21  ;;  %v1593_v51 = vadd.f32 %v1592_v36, %v3145_v18  ;;  %v3671_v24 = vld [vmem:[#allocation15_spill] sm:$0xff] }
 0x1f9   : > { %v1594_v33 = vadd.f32 %v3130_v60, %v1593_v51  ;;  %v1854_v55 = vadd.f32 %v1853_v62, %v1727_v54  ;;  %v1732_v60 = vmul.f32 %v3150_v30, %v3150_v30 }
 0x1fb   : > { %v1855_v15 = vadd.f32 %v1854_v55, %v1728_v28  ;;  %v1595_v39 = vadd.f32 %v3140_v11, %v1594_v33  ;;  %v1733_v11 = vmul.f32 %v3160_v48, %v3160_v48 }
 0x1fd   : > { %v1596_v3 = vadd.f32 %v1595_v39, %v3155_v38  ;;  %v1856_v27 = vadd.f32 %v1855_v15, %v1729_v43 }
 0x1ff   : > { %v1857_v49 = vadd.f32 %v1856_v27, %v1730_v32  ;;  %v1597_v18 = vadd.f32 %v1596_v3, %v3165_v57  ;;  %v3675_v27 = vld [vmem:[#allocation18_spill] sm:$0xff] }
 0x201   : > { %v1598_v46 = vadd.f32 %v3150_v30, %v1597_v18  ;;  %v1858_v35 = vadd.f32 %v1857_v49, %v1731_v0  ;;  %v1736_v30 = vmul.f32 %v3170_v4, %v3170_v4  ;;  %v1749_v49 = vmul.f32 %v3675_v27, %v3675_v27 }
 0x203   : > { %v1859_v59 = vadd.f32 %v1858_v35, %v1732_v60  ;;  %v1599_v10 = vadd.f32 %v3160_v48, %v1598_v46  ;;  %v1737_v48 = vmul.f32 %v3180_v25, %v3180_v25  ;;  %v3676_v60 = vld [vmem:[#allocation21_spill] sm:$0xff] }
 0x204   : > { %v1750_v35 = vmul.f32 %v3676_v60, %v3676_v60 }
 0x205   : > { %v1600_v38 = vadd.f32 %v1599_v10, %v3175_v14  ;;  %v1860_v61 = vadd.f32 %v1859_v59, %v1733_v11  ;;  %v3677_v10 = vld [vmem:[#allocation23_spill] sm:$0xff] }
 0x207   : > { %v1861_v40 = vadd.f32 %v1860_v61, %v1734_v58  ;;  %v1601_v57 = vadd.f32 %v1600_v38, %v3185_v37  ;;  %v1751_v58 = vmul.f32 %v3677_v10, %v3677_v10  ;;  %v3678_v61 = vld [vmem:[#allocation20_spill] sm:$0xff] }
 0x209   : > { %v1602_v8 = vadd.f32 %v3170_v4, %v1601_v57  ;;  %v1862_v52 = vadd.f32 %v1861_v40, %v1735_v34  ;;  %v1740_v4 = vmul.f32 %v3190_v50, %v3190_v50  ;;  %v1752_v40 = vmul.f32 %v3678_v61, %v3678_v61 }
 0x20b   : > { %v1863_v6 = vadd.f32 %v1862_v52, %v1736_v30  ;;  %v1603_v12 = vadd.f32 %v3180_v25, %v1602_v8  ;;  %v1741_v25 = vmul.f32 %v3200_v9, %v3200_v9  ;;  %v3679_v30 = vld [vmem:[#allocation22_spill] sm:$0xff] }
 0x20c   : > { %v1753_v8 = vmul.f32 %v3679_v30, %v3679_v30 }
 0x20d   : > { %v1604_v14 = vadd.f32 %v1603_v12, %v3195_v63  ;;  %v1864_v19 = vadd.f32 %v1863_v6, %v1737_v48  ;;  %v3680_v6 = vld [vmem:[#allocation25_spill] sm:$0xff] }
 0x20f   : > { %v1865_v16 = vadd.f32 %v1864_v19, %v1738_v7  ;;  %v1605_v37 = vadd.f32 %v1604_v14, %v3205_v23  ;;  %v1754_v14 = vmul.f32 %v3680_v6, %v3680_v6 }
 0x211   : > { %v1606_v20 = vadd.f32 %v3190_v50, %v1605_v37  ;;  %v1866_v29 = vadd.f32 %v1865_v16, %v1739_v45  ;;  %v1744_v50 = vmul.f32 %v3210_v42, %v3210_v42  ;;  %v1755_v37 = vmul.f32 %v3285_v47, %v3285_v47  ;;  %v3681_v45 = vld [vmem:[#allocation24_spill] sm:$0xff] }
 0x213   : > { %v1867_v1 = vadd.f32 %v1866_v29, %v1740_v4  ;;  %v1607_v41 = vadd.f32 %v3200_v9, %v1606_v20  ;;  %v1745_v9 = vmul.f32 %v3671_v24, %v3671_v24  ;;  %v1756_v4 = vmul.f32 %v3681_v45, %v3681_v45 }
 0x215   : > { %v1608_v63 = vadd.f32 %v1607_v41, %v3215_v56  ;;  %v1868_v13 = vadd.f32 %v1867_v1, %v1741_v25  ;;  %v3672_v56 = vld [vmem:[#allocation17_spill] sm:$0xff]  ;;  %v3682_v25 = vld [vmem:[#allocation26_spill] sm:$0xff] }
 0x216   : > { %v1746_v28 = vmul.f32 %v3672_v56, %v3672_v56  ;;  %v1757_v1 = vmul.f32 %v3682_v25, %v3682_v25 }
 0x217   : > { %v1869_v26 = vadd.f32 %v1868_v13, %v1742_v5  ;;  %v1609_v23 = vadd.f32 %v1608_v63, %v3225_v22  ;;  %v3673_v22 = vld [vmem:[#allocation19_spill] sm:$0xff]  ;;  %v1758_v13 = vmul.f32 %v3293_v53, %v3293_v53 }
 0x218   : > { %v1747_v15 = vmul.f32 %v3673_v22, %v3673_v22 }
 0x219   : > { %v1610_v36 = vadd.f32 %v3210_v42, %v1609_v23  ;;  %v1870_v21 = vadd.f32 %v1869_v26, %v1743_v44  ;;  %v3674_v42 = vld [vmem:[#allocation16_spill] sm:$0xff]  ;;  %v1759_v44 = vmul.f32 %v3307_v17, %v3307_v17 }
 0x21a   : > { %v1748_v39 = vmul.f32 %v3674_v42, %v3674_v42 }
 0x21b   : > { %v1871_v62 = vadd.f32 %v1870_v21, %v1744_v50  ;;  %v1611_v51 = vadd.f32 %v3671_v24, %v1610_v36  ;;  %v1760_v50 = vmul.f32 %v3289_v31, %v3289_v31  ;;  %v1761_v24 = vmul.f32 %v3300_v2, %v3300_v2 }
 0x21d   : > { %v1612_v54 = vadd.f32 %v1611_v51, %v3672_v56  ;;  %v1872_v33 = vadd.f32 %v1871_v62, %v1745_v9  ;;  %v1895_v56 = vlaneseq }
 0x21f   : > { %v1873_v55 = vadd.f32 %v1872_v33, %v1746_v28  ;;  %v1613_v43 = vadd.f32 %v1612_v54, %v3673_v22 }
 0x221   : > { %v1614_v3 = vadd.f32 %v3674_v42, %v1613_v43  ;;  %v1874_v32 = vadd.f32 %v1873_v55, %v1747_v15  ;;  %v1896_v55 = vshrl.u32 %v1895_v56, 7 }
 0x223   : > { %v1875_v18 = vadd.f32 %v1874_v32, %v1748_v39  ;;  %v1615_v0 = vadd.f32 %v3675_v27, %v1614_v3  ;;  %vm1897_vm0 = vcmp.eq.s32.totalorder %v1896_v55, 0 }
 0x225   : > { %v1616_v46 = vadd.f32 %v1615_v0, %v3676_v60  ;;  %v1876_v11 = vadd.f32 %v1875_v18, %v1749_v49 }
 0x227   : > { %v1877_v59 = vadd.f32 %v1876_v11, %v1750_v35  ;;  %v1617_v38 = vadd.f32 %v1616_v46, %v3677_v10 }
 0x229   : > { %v1618_v57 = vadd.f32 %v3678_v61, %v1617_v38  ;;  %v1878_v34 = vadd.f32 %v1877_v59, %v1751_v58 }
 0x22b   : > { %v1879_v52 = vadd.f32 %v1878_v34, %v1752_v40  ;;  %v1619_v48 = vadd.f32 %v3679_v30, %v1618_v57 }
 0x22d   : > { %v1620_v12 = vadd.f32 %v1619_v48, %v3680_v6  ;;  %v1880_v7 = vadd.f32 %v1879_v52, %v1753_v8 }
 0x22f   : > { %v1881_v19 = vadd.f32 %v1880_v7, %v1754_v14  ;;  %v1621_v16 = vadd.f32 %v1620_v12, %v3285_v47 }
 0x231   : > { %v1622_v20 = vadd.f32 %v3681_v45, %v1621_v16  ;;  %v1882_v29 = vadd.f32 %v1881_v19, %v1755_v37 }
 0x233   : > { %v1883_v41 = vadd.f32 %v1882_v29, %v1756_v4  ;;  %v1623_v63 = vadd.f32 %v3682_v25, %v1622_v20 }
 0x235   : > { %v1624_v5 = vadd.f32 %v1623_v63, %v3293_v53  ;;  %v1884_v26 = vadd.f32 %v1883_v41, %v1757_v1 }
 0x237   : > { %v1885_v47 = vadd.f32 %v1884_v26, %v1758_v13  ;;  %v1625_v23 = vadd.f32 %v1624_v5, %v3307_v17 }
 0x239   : > { %v1626_v36 = vadd.f32 %v3289_v31, %v1625_v23  ;;  %v1886_v21 = vadd.f32 %v1885_v47, %v1759_v44 }
 0x23b   : > { %v1627_v53 = vadd.f32 %v3300_v2, %v1626_v36  ;;  %v1887_v9 = vadd.f32 %v1886_v21, %v1760_v50 }
 0x23d   : > { %v1628_v62 = vrot.slane %v1627_v53, 4  ;;  %v1888_v51 = vadd.f32 %v1887_v9, %v1761_v24 }
 0x23f   : > { %v1629_v54 = vadd.f32 %v1628_v62, %v1627_v53  ;;  %v1889_v28 = vrot.slane %v1888_v51, 4 }
 0x241   : > { %v1630_v17 = vrot.slane %v1629_v54, 2  ;;  %v1890_v33 = vadd.f32 %v1889_v28, %v1888_v51 }
 0x243   : > { %v1631_v22 = vadd.f32 %v1630_v17, %v1629_v54  ;;  %v1891_v31 = vrot.slane %v1890_v33, 2 }
 0x245   : > { %v1632_v43 = vrot.slane %v1631_v22, 1  ;;  %v1892_v15 = vadd.f32 %v1891_v31, %v1890_v33 }
 0x247   : > { %v1893_v2 = vrot.slane %v1892_v15, 1  ;;  %v1633_v42 = vadd.f32 %v1632_v43, %v1631_v22 }
 0x249   : > { %v1894_v39 = vadd.f32 %v1893_v2, %v1892_v15  ;;  %v1898_v3 = vsel %vm1897_vm0, %v1633_v42, 0.0 }
 0x24a   : > { %1899 = vst [vmem:[%s241_s30] sm:$0xff] %v1898_v3 }
 0x24b   : > { %v1900_v32 = vsel %vm1897_vm0, %v1894_v39, 0.0 }
 0x24c   : > { %2660 = shalt.err (!%p2657_p5)
}
 0x24d   : > { %s2661_s6 = scalar_lea.hbm %s3538_s8, 128  ;;  %s2665_s30 = scalar_lea.hbm %s3616_s3, 1024 }
 0x24e   : > { %p2662_p2 = scmp.ne.s32.totalorder %s3538_s8, %s2661_s6  ;;  %p2666_p6 = scmp.lt.s32.totalorder %s3538_s8, %s3616_s3 }
 0x24f   : > { %p2667_p8 = scmp.lt.s32.totalorder %s2665_s30, %s2661_s6 }
 0x250   : > { %p2663_p1 = pnand %p2662_p2, %p3670_p10 }
 0x251   : > { %p2668_p3 = por %p2667_p8, %p2666_p6 }
 0x252   : > { %p2664_p4 = pneg %p2663_p1 }
 0x254   : > { %p2669_p7 = pnand %p2668_p3, %p2664_p4 }
 0x256   : > { %2672 = shalt.err (!%p2669_p7)
}
 0x257   : > { %2431 = dma.vmem_to_hbm [thread:$0]  (%p3670_p10), %s3540_s14, 128, %s3538_s8, %s3549_s13   ;;  %1901 = vst [vmem:[%s3532_s24] sm:$0xff] %v1900_v32 }
 0x258   : > { %s2673_s19 = scalar_lea.vmem %s3547_s11, 128  ;;  %s2755_s20 = smov [#allocation10]  }
 0x259   : > { %p2674_p9 = scmp.ne.s32.totalorder %s3547_s11, %s2673_s19  ;;  %s2677_s21 = sshll.u32 %s2755_s20, 4  ;;  %s2678_s21 = int_to_ptr.vmem [resolvable:$false] %s2677_s21 }
 0x25a   : > { %s2679_s23 = scalar_lea.vmem %s2678_s21, 256  ;;  %p2680_p13 = scmp.lt.s32.totalorder %s3547_s11, %s2678_s21 }
 0x25b   : > { %p2675_p11 = pnand %p2674_p9, %p3670_p10  ;;  %p2681_p0 = scmp.lt.s32.totalorder %s2679_s23, %s2673_s19 }
 0x25d   : > { %p2676_p12 = pneg %p2675_p11  ;;  %p2682_p5 = por %p2681_p0, %p2680_p13 }
 0x25f   : > { %p2683_p2 = pnand %p2682_p5, %p2676_p12 }
 0x261   : > { %2686 = shalt.err (!%p2683_p2)
}
 0x262   : > { %s2687_s14 = scalar_lea.hbm %s3545_s12, 128  ;;  %s2691_s5 = scalar_lea.hbm %s3617_s4, 1024 }
 0x263   : > { %p2688_p1 = scmp.ne.s32.totalorder %s3545_s12, %s2687_s14  ;;  %p2692_p8 = scmp.lt.s32.totalorder %s3545_s12, %s3617_s4 }
 0x264   : > { %p2693_p3 = scmp.lt.s32.totalorder %s2691_s5, %s2687_s14 }
 0x265   : > { %p2689_p4 = pnand %p2688_p1, %p3670_p10 }
 0x266   : > { %p2694_p7 = por %p2693_p3, %p2692_p8 }
 0x267   : > { %p2690_p6 = pneg %p2689_p4 }
 0x269   : > { %p2695_p9 = pnand %p2694_p7, %p2690_p6 }
 0x26b   : > { %2698 = shalt.err (!%p2695_p9)
}
 0x26c   : > { %2432 = dma.vmem_to_hbm [thread:$0]  (%p3670_p10), %s3547_s11, 128, %s3545_s12, %s3549_s13  }
 0x26d PF: > { %p2457_p11 = scmp.ge.s32.totalorder %s2745_s18, 2  ;;  %s1967_s28 = sand.u32 1, %s2733_s15  }
 0x26e   : > { %p3683_p12 = scmp.ne.s32.totalorder %s3648_s22, 0  ;;  %s1968_s29 = scalar_lea.sflag [#allocation4], %s1967_s28 }
 0x270   : > { %p2445_p13 = pnand %p2457_p11, %p3683_p12 }
 0x272   : > { %p2446_p0 = pneg %p2445_p13 }
 0x274   : > { %2724 = dma.done.wait (%p2446_p0), %s1968_s29, 16384  }
 0x275   : > { %2726 = vsyncadd (%p2446_p0), %s1968_s29, 4294950912  ;;  %s3684_s30 = sadd.s32 4294967294, %s2745_s18  }
 0x276   : > { %s1976_s7 = sand.u32 1, %s3684_s30  }
 0x277   : > { %s1977_s10 = scalar_lea.sflag [#allocation9], %s1976_s7 }
 0x278   : > { %2728 = dma.done.wait (%p2446_p0), %s1977_s10, 256  }
 0x279   : > { %2730 = vsyncadd (%p2446_p0), %s1977_s10, 4294967040  ;;  %p22_p10 = scmp.ge.s32.totalorder %s2836_s27, 10   ;;  %s3685_s15 = smov %s2737_s16 }
 0x27a   : > { %s3686_s16 = smov %s2741_s17  ;;  %s3687_s17 = smov %s2856_s9 }
 0x27b   : > { %s3688_s18 = smov %s2836_s27  ;;  %24 = sbr.rel (!%p22_p10) target bundleno = 8 (0x8), region = 109 }
 0x280   :  { %1991 = vsyncpa [#allocation3], 1 }
 0x281   :  { %1993 = vsyncpa [#allocation3 + $0x1], 1 }
 0x282   :  { %1994 = vsyncpa [#allocation6], 1 }
 0x283   :  { %1995 = vsyncpa [#allocation4], 1 }
 0x284   :  { %1997 = vsyncpa [#allocation4 + $0x1], 1 }
 0x285   :  { %1998 = vsyncpa [#allocation9], 1 }
 0x286   :  { %2000 = vsyncpa [#allocation9 + $0x1], 1 }

</bundles_post_ra>
